<compile_context>
chip_gen: v7x
topology: tpu7x:2x2x1
jax: 0.10.0
libtpu: 0.0.40
codegen_flags: <defaults>
</compile_context>

<pallas_src>
import functools

import numpy as np
import jax
import jax.numpy as jnp
from jax import lax
from jax.experimental import pallas as pl
from jax.experimental.pallas import tpu as pltpu


def _sigmoid(v):
    # exp runs on the EUP; exact reciprocal keeps bit-level agreement with the
    # pure-JAX reference (approx=True would use the EUP vrcp but costs ~1e-4
    # relative error, which would fail the tight correctness check below).
    return pl.reciprocal(1.0 + jnp.exp(-v))


def attention_kernel(x_ref, w1_ref, b1_ref, w2_ref, b2_ref,
                     wmax_ref, wmean_ref, bn_ref, o_ref, *, width):
    """Block = (Bblk, C, P): channels on sublanes, flattened H*W on lanes."""
    bblk, C, P = x_ref.shape
    inv_p = 1.0 / P
    inv_c = 1.0 / C

    # ---- Channel attention -------------------------------------------------
    # avg+max spatial pools for every batch element in the block, then ONE
    # fused MLP (2 MXU dots total) over the (C, 2*Bblk) column stack instead
    # of 4 tiny dots per batch element.
    avg_cols = []
    max_cols = []
    for b in range(bblk):
        xb = x_ref[b]                                              # (C, P)
        avg_cols.append(jnp.sum(xb, axis=1, keepdims=True) * inv_p)
        max_cols.append(jnp.max(xb, axis=1, keepdims=True))
    pooled = jnp.concatenate(avg_cols + max_cols, axis=1)          # (C, 2*Bblk)

    h = jnp.maximum(
        jnp.dot(w1_ref[...], pooled, preferred_element_type=jnp.float32)
        + b1_ref[...], 0.0)                                        # (Ch, 2*Bblk)
    att = (jnp.dot(w2_ref[...], h, preferred_element_type=jnp.float32)
           + b2_ref[...])                                          # (C, 2*Bblk)
    scale_ch = _sigmoid(att[:, :bblk] + att[:, bblk:])             # (C, Bblk)

    # ---- Spatial attention -------------------------------------------------
    # channel max/mean compress -> 3x3 "same" conv as a 9-tap shifted-add
    # stencil (XLU lane rolls + per-tap weight*border-mask maps with the BN
    # scale already folded in) -> + BN shift -> sigmoid -> rescale.
    bn_shift = bn_ref[0]

    for b in range(bblk):
        x1 = x_ref[b] * scale_ch[:, b:b + 1]                       # (C, P)
        c_max = jnp.max(x1, axis=0, keepdims=True)                 # (1, P)
        c_mean = jnp.sum(x1, axis=0, keepdims=True) * inv_c        # (1, P)

        conv = jnp.zeros((1, P), jnp.float32)
        t = 0
        for dh in (-1, 0, 1):
            for dw in (-1, 0, 1):
                # output p=(h,w) needs input at p + dh*W + dw (zero-padded).
                shift = (-(dh * width + dw)) % P
                rm = pltpu.roll(c_max, shift=shift, axis=1) if shift else c_max
                ra = pltpu.roll(c_mean, shift=shift, axis=1) if shift else c_mean
                conv = conv + rm * wmax_ref[t] + ra * wmean_ref[t]
                t += 1

        o_ref[b] = x1 * _sigmoid(conv + bn_shift)


def _stencil_border_masks(H, W):
    """(9, H*W) 0/1 maps: tap t=(dh,dw) is valid at output (h,w) iff the input
    neighbour (h+dh, w+dw) lies inside the image (zero padding of 'same' conv)."""
    masks = np.zeros((9, H * W), np.float32)
    t = 0
    for dh in (-1, 0, 1):
        for dw in (-1, 0, 1):
            m = np.zeros((H, W), np.float32)
            m[max(0, -dh):H - max(0, dh), max(0, -dw):W - max(0, dw)] = 1.0
            masks[t] = m.reshape(-1)
            t += 1
    return masks


def attention_network(x, params, *, max_batch_block=8):
    B, C, H, W = x.shape
    P = H * W
    Ch = params["w1"].shape[0]

    # Largest divisor of B that is <= max_batch_block (amortize per-step
    # overhead; keep the batch grid axis "parallel" for megacore sharding).
    bblk = 1
    for cand in range(min(B, max_batch_block), 0, -1):
        if B % cand == 0:
            bblk = cand
            break

    x2 = x.reshape(B, C, P)
    b1 = params["b1"].reshape(Ch, 1)
    b2 = params["b2"].reshape(C, 1)

    # Fold eval-mode BatchNorm into the conv: multiplicative scale goes into
    # the 3x3 tap weights, only the additive shift stays as an SMEM scalar.
    eps = 1e-5
    bn_scale = params["bn_gamma"][0] / jnp.sqrt(params["bn_var"][0] + eps)
    bn_shift = (params["bn_beta"] - params["bn_mean"] * bn_scale).astype(jnp.float32)  # (1,)

    masks = jnp.asarray(_stencil_border_masks(H, W))                       # (9, P)
    wmax_maps = (masks * (params["conv_w"][0, 0].reshape(9, 1) * bn_scale)
                 ).astype(jnp.float32).reshape(9, 1, P)
    wmean_maps = (masks * (params["conv_w"][0, 1].reshape(9, 1) * bn_scale)
                  ).astype(jnp.float32).reshape(9, 1, P)

    kernel = functools.partial(attention_kernel, width=W)

    out = pl.pallas_call(
        kernel,
        out_shape=jax.ShapeDtypeStruct((B, C, P), jnp.float32),
        grid=(B // bblk,),
        in_specs=[
            pl.BlockSpec((bblk, C, P), lambda i: (i, 0, 0)),    # x (batch block)
            pl.BlockSpec((Ch, C), lambda i: (0, 0)),            # W1
            pl.BlockSpec((Ch, 1), lambda i: (0, 0)),            # b1
            pl.BlockSpec((C, Ch), lambda i: (0, 0)),            # W2
            pl.BlockSpec((C, 1), lambda i: (0, 0)),             # b2
            pl.BlockSpec((9, 1, P), lambda i: (0, 0, 0)),       # tap weight*mask (max ch.)
            pl.BlockSpec((9, 1, P), lambda i: (0, 0, 0)),       # tap weight*mask (mean ch.)
            pl.BlockSpec(memory_space=pltpu.MemorySpace.SMEM),  # BN shift scalar
        ],
        out_specs=pl.BlockSpec((bblk, C, P), lambda i: (i, 0, 0)),
        compiler_params=pltpu.CompilerParams(dimension_semantics=("parallel",)),
    )(x2, params["w1"], b1, params["w2"], b2, wmax_maps, wmean_maps, bn_shift)

    return out.reshape(B, C, H, W)


def init_params(C, reduction_ratio, key):
    Ch = C // reduction_ratio
    k1, k2, k3, k4, k5, k6, k7, k8, k9 = jax.random.split(key, 9)
    w1 = jax.random.normal(k1, (Ch, C), jnp.float32) * 0.1    # Linear(C -> C//r), torch (out,in)
    b1 = jax.random.normal(k2, (Ch,), jnp.float32) * 0.1
    w2 = jax.random.normal(k3, (C, Ch), jnp.float32) * 0.1    # Linear(C//r -> C)
    b2 = jax.random.normal(k4, (C,), jnp.float32) * 0.1
    conv_w = jax.random.normal(k5, (1, 2, 3, 3), jnp.float32) * 0.1  # Conv2d(2,1,3,pad=1,bias=False)
    bn_gamma = 1.0 + 0.1 * jax.random.normal(k6, (1,), jnp.float32)  # BatchNorm2d(1), eval mode
    bn_beta = 0.1 * jax.random.normal(k7, (1,), jnp.float32)
    bn_mean = 0.1 * jax.random.normal(k8, (1,), jnp.float32)
    bn_var = 1.0 + 0.1 * jax.random.uniform(k9, (1,), jnp.float32)
    return dict(w1=w1, b1=b1, w2=w2, b2=b2, conv_w=conv_w,
                bn_gamma=bn_gamma, bn_beta=bn_beta, bn_mean=bn_mean, bn_var=bn_var)


def reference(x, p):
    """Pure-JAX reference of Attention_Network.forward (eval-mode BN), NCHW."""
    eps = 1e-5
    avg = x.mean(axis=(2, 3))
    mx = x.max(axis=(2, 3))

    def mlp(v):
        h = jnp.maximum(v @ p["w1"].T + p["b1"], 0.0)
        return h @ p["w2"].T + p["b2"]

    scale_c = jax.nn.sigmoid(mlp(avg) + mlp(mx))[:, :, None, None]
    x1 = x * scale_c
    comp = jnp.concatenate([x1.max(axis=1, keepdims=True),
                            x1.mean(axis=1, keepdims=True)], axis=1)   # (B,2,H,W)
    conv = lax.conv_general_dilated(comp, p["conv_w"], (1, 1), "SAME",
                                    dimension_numbers=("NCHW", "OIHW", "NCHW"))
    bn = ((conv - p["bn_mean"][None, :, None, None])
          / jnp.sqrt(p["bn_var"][None, :, None, None] + eps)
          * p["bn_gamma"][None, :, None, None] + p["bn_beta"][None, :, None, None])
    return x1 * jax.nn.sigmoid(bn)


if __name__ == "__main__":
    B, C, H, W = 2, 24, 16, 16       # gate_channels=24, reduction_ratio=12 -> hidden=2
    reduction_ratio = 12

    key = jax.random.PRNGKey(0)
    kx, kp = jax.random.split(key)
    x = jax.random.normal(kx, (B, C, H, W), jnp.float32)
    params = init_params(C, reduction_ratio, kp)

    out = attention_network(x, params)
    out = jax.block_until_ready(out)

    ref = reference(x, params)
    assert out.shape == (B, C, H, W)
    np.testing.assert_allclose(np.asarray(out), np.asarray(ref), rtol=1e-4, atol=1e-5)
    print("KERNEL_OK")
</pallas_src>

<mosaic_0001>
module attributes {stable_mosaic.version = 11 : i64} {
  func.func @attention_kernel(%arg0: i32, %arg1: memref<2x24x256xf32, #tpu.memory_space<vmem>>, %arg2: memref<2x24xf32, #tpu.memory_space<vmem>>, %arg3: memref<2x1xf32, #tpu.memory_space<vmem>>, %arg4: memref<24x2xf32, #tpu.memory_space<vmem>>, %arg5: memref<24x1xf32, #tpu.memory_space<vmem>>, %arg6: memref<9x1x256xf32, #tpu.memory_space<vmem>>, %arg7: memref<9x1x256xf32, #tpu.memory_space<vmem>>, %arg8: memref<1xf32, #tpu.memory_space<smem>>, %arg9: memref<2x24x256xf32, #tpu.memory_space<vmem>>) attributes {dimension_semantics = [#tpu.dimension_semantics<parallel>], iteration_bounds = array<i64: 1>, scalar_prefetch = 0 : i64, scratch_operands = 0 : i64, tpu.core_type = #tpu.core_type<tc>, window_params = [{transform_indices = @transform_0, window_bounds = array<i64: 2, 24, 256>}, {pipeline_mode = #tpu.pipeline_mode<synchronous>, transform_indices = @transform_1, window_bounds = array<i64: 2, 24>}, {pipeline_mode = #tpu.pipeline_mode<synchronous>, transform_indices = @transform_2, window_bounds = array<i64: 2, 1>}, {pipeline_mode = #tpu.pipeline_mode<synchronous>, transform_indices = @transform_3, window_bounds = array<i64: 24, 2>}, {pipeline_mode = #tpu.pipeline_mode<synchronous>, transform_indices = @transform_4, window_bounds = array<i64: 24, 1>}, {pipeline_mode = #tpu.pipeline_mode<synchronous>, transform_indices = @transform_5, window_bounds = array<i64: 9, 1, 256>}, {pipeline_mode = #tpu.pipeline_mode<synchronous>, transform_indices = @transform_6, window_bounds = array<i64: 9, 1, 256>}, {transform_indices = @transform_7, window_bounds = array<i64: 1>}, {transform_indices = @transform_8, window_bounds = array<i64: 2, 24, 256>}]} {
    %c0 = arith.constant 0 : index
    %c0_0 = arith.constant 0 : index
    %c0_1 = arith.constant 0 : index
    %0 = vector.load %arg1[%c0, %c0_0, %c0_1] : memref<2x24x256xf32, #tpu.memory_space<vmem>>, vector<1x24x256xf32>
    %1 = vector.shape_cast %0 : vector<1x24x256xf32> to vector<24x256xf32>
    %cst = arith.constant dense<0.000000e+00> : vector<24xf32>
    %2 = vector.multi_reduction <add>, %1, %cst [1] : vector<24x256xf32> to vector<24xf32>
    %3 = vector.shape_cast %2 : vector<24xf32> to vector<24x1xf32>
    %cst_2 = arith.constant 3.906250e-03 : f32
    %4 = vector.broadcast %cst_2 : f32 to vector<24x1xf32>
    %5 = arith.mulf %3, %4 : vector<24x1xf32>
    %cst_3 = arith.constant dense<0xFF800000> : vector<24xf32>
    %6 = vector.multi_reduction <maximumf>, %1, %cst_3 [1] : vector<24x256xf32> to vector<24xf32>
    %7 = vector.shape_cast %6 : vector<24xf32> to vector<24x1xf32>
    %c1 = arith.constant 1 : index
    %c0_4 = arith.constant 0 : index
    %c0_5 = arith.constant 0 : index
    %8 = vector.load %arg1[%c1, %c0_4, %c0_5] : memref<2x24x256xf32, #tpu.memory_space<vmem>>, vector<1x24x256xf32>
    %9 = vector.shape_cast %8 : vector<1x24x256xf32> to vector<24x256xf32>
    %cst_6 = arith.constant dense<0.000000e+00> : vector<24xf32>
    %10 = vector.multi_reduction <add>, %9, %cst_6 [1] : vector<24x256xf32> to vector<24xf32>
    %11 = vector.shape_cast %10 : vector<24xf32> to vector<24x1xf32>
    %cst_7 = arith.constant 3.906250e-03 : f32
    %12 = vector.broadcast %cst_7 : f32 to vector<24x1xf32>
    %13 = arith.mulf %11, %12 : vector<24x1xf32>
    %cst_8 = arith.constant dense<0xFF800000> : vector<24xf32>
    %14 = vector.multi_reduction <maximumf>, %9, %cst_8 [1] : vector<24x256xf32> to vector<24xf32>
    %15 = vector.shape_cast %14 : vector<24xf32> to vector<24x1xf32>
    %16 = tpu.concatenate %5, %13, %7, %15 in 1 : vector<24x1xf32>, vector<24x1xf32>, vector<24x1xf32>, vector<24x1xf32> -> vector<24x4xf32>
    %c0_9 = arith.constant 0 : index
    %c0_10 = arith.constant 0 : index
    %17 = vector.load %arg2[%c0_9, %c0_10] : memref<2x24xf32, #tpu.memory_space<vmem>>, vector<2x24xf32>
    %cst_11 = arith.constant dense<0.000000e+00> : vector<2x4xf32>
    %18 = tpu.matmul %17, %16, %cst_11 {dimension_numbers = #tpu.dot_dimension_numbers<[1], [0], [0], [1], [0, 0, 1, 1], [], []>} : vector<2x24xf32>, vector<24x4xf32>, vector<2x4xf32> -> vector<2x4xf32>
    %c0_12 = arith.constant 0 : index
    %c0_13 = arith.constant 0 : index
    %19 = vector.load %arg3[%c0_12, %c0_13] : memref<2x1xf32, #tpu.memory_space<vmem>>, vector<2x1xf32>
    %20 = vector.broadcast %19 : vector<2x1xf32> to vector<2x4xf32>
    %21 = arith.addf %18, %20 : vector<2x4xf32>
    %cst_14 = arith.constant 0.000000e+00 : f32
    %22 = vector.broadcast %cst_14 : f32 to vector<2x4xf32>
    %23 = arith.maximumf %21, %22 : vector<2x4xf32>
    %c0_15 = arith.constant 0 : index
    %c0_16 = arith.constant 0 : index
    %24 = vector.load %arg4[%c0_15, %c0_16] : memref<24x2xf32, #tpu.memory_space<vmem>>, vector<24x2xf32>
    %cst_17 = arith.constant dense<0.000000e+00> : vector<24x4xf32>
    %25 = tpu.matmul %24, %23, %cst_17 {dimension_numbers = #tpu.dot_dimension_numbers<[1], [0], [0], [1], [0, 0, 1, 1], [], []>} : vector<24x2xf32>, vector<2x4xf32>, vector<24x4xf32> -> vector<24x4xf32>
    %c0_18 = arith.constant 0 : index
    %c0_19 = arith.constant 0 : index
    %26 = vector.load %arg5[%c0_18, %c0_19] : memref<24x1xf32, #tpu.memory_space<vmem>>, vector<24x1xf32>
    %27 = vector.broadcast %26 : vector<24x1xf32> to vector<24x4xf32>
    %28 = arith.addf %25, %27 : vector<24x4xf32>
    %29 = vector.extract_strided_slice %28 {offsets = [0, 0], sizes = [24, 2], strides = [1, 1]} : vector<24x4xf32> to vector<24x2xf32>
    %30 = vector.extract_strided_slice %28 {offsets = [0, 2], sizes = [24, 2], strides = [1, 1]} : vector<24x4xf32> to vector<24x2xf32>
    %31 = arith.addf %29, %30 : vector<24x2xf32>
    %cst_20 = arith.constant 0.000000e+00 : f32
    %32 = vector.broadcast %cst_20 : f32 to vector<24x2xf32>
    %33 = arith.subf %32, %31 : vector<24x2xf32>
    %34 = math.exp %33 : vector<24x2xf32>
    %cst_21 = arith.constant 1.000000e+00 : f32
    %35 = vector.broadcast %cst_21 : f32 to vector<24x2xf32>
    %36 = arith.addf %35, %34 : vector<24x2xf32>
    %37 = tpu.reciprocal %36 : vector<24x2xf32> -> vector<24x2xf32>
    %c0_22 = arith.constant 0 : index
    %38 = memref.load %arg8[%c0_22] : memref<1xf32, #tpu.memory_space<smem>>
    %c0_23 = arith.constant 0 : index
    %c0_24 = arith.constant 0 : index
    %c0_25 = arith.constant 0 : index
    %39 = vector.load %arg1[%c0_23, %c0_24, %c0_25] : memref<2x24x256xf32, #tpu.memory_space<vmem>>, vector<1x24x256xf32>
    %40 = vector.shape_cast %39 : vector<1x24x256xf32> to vector<24x256xf32>
    %41 = vector.extract_strided_slice %37 {offsets = [0, 0], sizes = [24, 1], strides = [1, 1]} : vector<24x2xf32> to vector<24x1xf32>
    %42 = vector.broadcast %41 : vector<24x1xf32> to vector<24x256xf32>
    %43 = arith.mulf %40, %42 : vector<24x256xf32>
    %cst_26 = arith.constant dense<0xFF800000> : vector<256xf32>
    %44 = vector.multi_reduction <maximumf>, %43, %cst_26 [0] : vector<24x256xf32> to vector<256xf32>
    %45 = vector.shape_cast %44 : vector<256xf32> to vector<1x256xf32>
    %cst_27 = arith.constant dense<0.000000e+00> : vector<256xf32>
    %46 = vector.multi_reduction <add>, %43, %cst_27 [0] : vector<24x256xf32> to vector<256xf32>
    %47 = vector.shape_cast %46 : vector<256xf32> to vector<1x256xf32>
    %cst_28 = arith.constant 0.0416666679 : f32
    %48 = vector.broadcast %cst_28 : f32 to vector<1x256xf32>
    %49 = arith.mulf %47, %48 : vector<1x256xf32>
    %cst_29 = arith.constant 0.000000e+00 : f32
    %50 = vector.broadcast %cst_29 : f32 to vector<1x256xf32>
    %c17_i32 = arith.constant 17 : i32
    %51 = tpu.dynamic_rotate %45 by %c17_i32 dim 1 : vector<1x256xf32>, i32 -> vector<1x256xf32>
    %c17_i32_30 = arith.constant 17 : i32
    %52 = tpu.dynamic_rotate %49 by %c17_i32_30 dim 1 : vector<1x256xf32>, i32 -> vector<1x256xf32>
    %c0_31 = arith.constant 0 : index
    %c0_32 = arith.constant 0 : index
    %c0_33 = arith.constant 0 : index
    %53 = vector.load %arg6[%c0_31, %c0_32, %c0_33] : memref<9x1x256xf32, #tpu.memory_space<vmem>>, vector<1x1x256xf32>
    %54 = vector.shape_cast %53 : vector<1x1x256xf32> to vector<1x256xf32>
    %55 = arith.mulf %51, %54 : vector<1x256xf32>
    %56 = arith.addf %50, %55 : vector<1x256xf32>
    %c0_34 = arith.constant 0 : index
    %c0_35 = arith.constant 0 : index
    %c0_36 = arith.constant 0 : index
    %57 = vector.load %arg7[%c0_34, %c0_35, %c0_36] : memref<9x1x256xf32, #tpu.memory_space<vmem>>, vector<1x1x256xf32>
    %58 = vector.shape_cast %57 : vector<1x1x256xf32> to vector<1x256xf32>
    %59 = arith.mulf %52, %58 : vector<1x256xf32>
    %60 = arith.addf %56, %59 : vector<1x256xf32>
    %c16_i32 = arith.constant 16 : i32
    %61 = tpu.dynamic_rotate %45 by %c16_i32 dim 1 : vector<1x256xf32>, i32 -> vector<1x256xf32>
    %c16_i32_37 = arith.constant 16 : i32
    %62 = tpu.dynamic_rotate %49 by %c16_i32_37 dim 1 : vector<1x256xf32>, i32 -> vector<1x256xf32>
    %c1_38 = arith.constant 1 : index
    %c0_39 = arith.constant 0 : index
    %c0_40 = arith.constant 0 : index
    %63 = vector.load %arg6[%c1_38, %c0_39, %c0_40] : memref<9x1x256xf32, #tpu.memory_space<vmem>>, vector<1x1x256xf32>
    %64 = vector.shape_cast %63 : vector<1x1x256xf32> to vector<1x256xf32>
    %65 = arith.mulf %61, %64 : vector<1x256xf32>
    %66 = arith.addf %60, %65 : vector<1x256xf32>
    %c1_41 = arith.constant 1 : index
    %c0_42 = arith.constant 0 : index
    %c0_43 = arith.constant 0 : index
    %67 = vector.load %arg7[%c1_41, %c0_42, %c0_43] : memref<9x1x256xf32, #tpu.memory_space<vmem>>, vector<1x1x256xf32>
    %68 = vector.shape_cast %67 : vector<1x1x256xf32> to vector<1x256xf32>
    %69 = arith.mulf %62, %68 : vector<1x256xf32>
    %70 = arith.addf %66, %69 : vector<1x256xf32>
    %c15_i32 = arith.constant 15 : i32
    %71 = tpu.dynamic_rotate %45 by %c15_i32 dim 1 : vector<1x256xf32>, i32 -> vector<1x256xf32>
    %c15_i32_44 = arith.constant 15 : i32
    %72 = tpu.dynamic_rotate %49 by %c15_i32_44 dim 1 : vector<1x256xf32>, i32 -> vector<1x256xf32>
    %c2 = arith.constant 2 : index
    %c0_45 = arith.constant 0 : index
    %c0_46 = arith.constant 0 : index
    %73 = vector.load %arg6[%c2, %c0_45, %c0_46] : memref<9x1x256xf32, #tpu.memory_space<vmem>>, vector<1x1x256xf32>
    %74 = vector.shape_cast %73 : vector<1x1x256xf32> to vector<1x256xf32>
    %75 = arith.mulf %71, %74 : vector<1x256xf32>
    %76 = arith.addf %70, %75 : vector<1x256xf32>
    %c2_47 = arith.constant 2 : index
    %c0_48 = arith.constant 0 : index
    %c0_49 = arith.constant 0 : index
    %77 = vector.load %arg7[%c2_47, %c0_48, %c0_49] : memref<9x1x256xf32, #tpu.memory_space<vmem>>, vector<1x1x256xf32>
    %78 = vector.shape_cast %77 : vector<1x1x256xf32> to vector<1x256xf32>
    %79 = arith.mulf %72, %78 : vector<1x256xf32>
    %80 = arith.addf %76, %79 : vector<1x256xf32>
    %c1_i32 = arith.constant 1 : i32
    %81 = tpu.dynamic_rotate %45 by %c1_i32 dim 1 : vector<1x256xf32>, i32 -> vector<1x256xf32>
    %c1_i32_50 = arith.constant 1 : i32
    %82 = tpu.dynamic_rotate %49 by %c1_i32_50 dim 1 : vector<1x256xf32>, i32 -> vector<1x256xf32>
    %c3 = arith.constant 3 : index
    %c0_51 = arith.constant 0 : index
    %c0_52 = arith.constant 0 : index
    %83 = vector.load %arg6[%c3, %c0_51, %c0_52] : memref<9x1x256xf32, #tpu.memory_space<vmem>>, vector<1x1x256xf32>
    %84 = vector.shape_cast %83 : vector<1x1x256xf32> to vector<1x256xf32>
    %85 = arith.mulf %81, %84 : vector<1x256xf32>
    %86 = arith.addf %80, %85 : vector<1x256xf32>
    %c3_53 = arith.constant 3 : index
    %c0_54 = arith.constant 0 : index
    %c0_55 = arith.constant 0 : index
    %87 = vector.load %arg7[%c3_53, %c0_54, %c0_55] : memref<9x1x256xf32, #tpu.memory_space<vmem>>, vector<1x1x256xf32>
    %88 = vector.shape_cast %87 : vector<1x1x256xf32> to vector<1x256xf32>
    %89 = arith.mulf %82, %88 : vector<1x256xf32>
    %90 = arith.addf %86, %89 : vector<1x256xf32>
    %c4 = arith.constant 4 : index
    %c0_56 = arith.constant 0 : index
    %c0_57 = arith.constant 0 : index
    %91 = vector.load %arg6[%c4, %c0_56, %c0_57] : memref<9x1x256xf32, #tpu.memory_space<vmem>>, vector<1x1x256xf32>
    %92 = vector.shape_cast %91 : vector<1x1x256xf32> to vector<1x256xf32>
    %93 = arith.mulf %45, %92 : vector<1x256xf32>
    %94 = arith.addf %90, %93 : vector<1x256xf32>
    %c4_58 = arith.constant 4 : index
    %c0_59 = arith.constant 0 : index
    %c0_60 = arith.constant 0 : index
    %95 = vector.load %arg7[%c4_58, %c0_59, %c0_60] : memref<9x1x256xf32, #tpu.memory_space<vmem>>, vector<1x1x256xf32>
    %96 = vector.shape_cast %95 : vector<1x1x256xf32> to vector<1x256xf32>
    %97 = arith.mulf %49, %96 : vector<1x256xf32>
    %98 = arith.addf %94, %97 : vector<1x256xf32>
    %c255_i32 = arith.constant 255 : i32
    %99 = tpu.dynamic_rotate %45 by %c255_i32 dim 1 : vector<1x256xf32>, i32 -> vector<1x256xf32>
    %c255_i32_61 = arith.constant 255 : i32
    %100 = tpu.dynamic_rotate %49 by %c255_i32_61 dim 1 : vector<1x256xf32>, i32 -> vector<1x256xf32>
    %c5 = arith.constant 5 : index
    %c0_62 = arith.constant 0 : index
    %c0_63 = arith.constant 0 : index
    %101 = vector.load %arg6[%c5, %c0_62, %c0_63] : memref<9x1x256xf32, #tpu.memory_space<vmem>>, vector<1x1x256xf32>
    %102 = vector.shape_cast %101 : vector<1x1x256xf32> to vector<1x256xf32>
    %103 = arith.mulf %99, %102 : vector<1x256xf32>
    %104 = arith.addf %98, %103 : vector<1x256xf32>
    %c5_64 = arith.constant 5 : index
    %c0_65 = arith.constant 0 : index
    %c0_66 = arith.constant 0 : index
    %105 = vector.load %arg7[%c5_64, %c0_65, %c0_66] : memref<9x1x256xf32, #tpu.memory_space<vmem>>, vector<1x1x256xf32>
    %106 = vector.shape_cast %105 : vector<1x1x256xf32> to vector<1x256xf32>
    %107 = arith.mulf %100, %106 : vector<1x256xf32>
    %108 = arith.addf %104, %107 : vector<1x256xf32>
    %c241_i32 = arith.constant 241 : i32
    %109 = tpu.dynamic_rotate %45 by %c241_i32 dim 1 : vector<1x256xf32>, i32 -> vector<1x256xf32>
    %c241_i32_67 = arith.constant 241 : i32
    %110 = tpu.dynamic_rotate %49 by %c241_i32_67 dim 1 : vector<1x256xf32>, i32 -> vector<1x256xf32>
    %c6 = arith.constant 6 : index
    %c0_68 = arith.constant 0 : index
    %c0_69 = arith.constant 0 : index
    %111 = vector.load %arg6[%c6, %c0_68, %c0_69] : memref<9x1x256xf32, #tpu.memory_space<vmem>>, vector<1x1x256xf32>
    %112 = vector.shape_cast %111 : vector<1x1x256xf32> to vector<1x256xf32>
    %113 = arith.mulf %109, %112 : vector<1x256xf32>
    %114 = arith.addf %108, %113 : vector<1x256xf32>
    %c6_70 = arith.constant 6 : index
    %c0_71 = arith.constant 0 : index
    %c0_72 = arith.constant 0 : index
    %115 = vector.load %arg7[%c6_70, %c0_71, %c0_72] : memref<9x1x256xf32, #tpu.memory_space<vmem>>, vector<1x1x256xf32>
    %116 = vector.shape_cast %115 : vector<1x1x256xf32> to vector<1x256xf32>
    %117 = arith.mulf %110, %116 : vector<1x256xf32>
    %118 = arith.addf %114, %117 : vector<1x256xf32>
    %c240_i32 = arith.constant 240 : i32
    %119 = tpu.dynamic_rotate %45 by %c240_i32 dim 1 : vector<1x256xf32>, i32 -> vector<1x256xf32>
    %c240_i32_73 = arith.constant 240 : i32
    %120 = tpu.dynamic_rotate %49 by %c240_i32_73 dim 1 : vector<1x256xf32>, i32 -> vector<1x256xf32>
    %c7 = arith.constant 7 : index
    %c0_74 = arith.constant 0 : index
    %c0_75 = arith.constant 0 : index
    %121 = vector.load %arg6[%c7, %c0_74, %c0_75] : memref<9x1x256xf32, #tpu.memory_space<vmem>>, vector<1x1x256xf32>
    %122 = vector.shape_cast %121 : vector<1x1x256xf32> to vector<1x256xf32>
    %123 = arith.mulf %119, %122 : vector<1x256xf32>
    %124 = arith.addf %118, %123 : vector<1x256xf32>
    %c7_76 = arith.constant 7 : index
    %c0_77 = arith.constant 0 : index
    %c0_78 = arith.constant 0 : index
    %125 = vector.load %arg7[%c7_76, %c0_77, %c0_78] : memref<9x1x256xf32, #tpu.memory_space<vmem>>, vector<1x1x256xf32>
    %126 = vector.shape_cast %125 : vector<1x1x256xf32> to vector<1x256xf32>
    %127 = arith.mulf %120, %126 : vector<1x256xf32>
    %128 = arith.addf %124, %127 : vector<1x256xf32>
    %c239_i32 = arith.constant 239 : i32
    %129 = tpu.dynamic_rotate %45 by %c239_i32 dim 1 : vector<1x256xf32>, i32 -> vector<1x256xf32>
    %c239_i32_79 = arith.constant 239 : i32
    %130 = tpu.dynamic_rotate %49 by %c239_i32_79 dim 1 : vector<1x256xf32>, i32 -> vector<1x256xf32>
    %c8 = arith.constant 8 : index
    %c0_80 = arith.constant 0 : index
    %c0_81 = arith.constant 0 : index
    %131 = vector.load %arg6[%c8, %c0_80, %c0_81] : memref<9x1x256xf32, #tpu.memory_space<vmem>>, vector<1x1x256xf32>
    %132 = vector.shape_cast %131 : vector<1x1x256xf32> to vector<1x256xf32>
    %133 = arith.mulf %129, %132 : vector<1x256xf32>
    %134 = arith.addf %128, %133 : vector<1x256xf32>
    %c8_82 = arith.constant 8 : index
    %c0_83 = arith.constant 0 : index
    %c0_84 = arith.constant 0 : index
    %135 = vector.load %arg7[%c8_82, %c0_83, %c0_84] : memref<9x1x256xf32, #tpu.memory_space<vmem>>, vector<1x1x256xf32>
    %136 = vector.shape_cast %135 : vector<1x1x256xf32> to vector<1x256xf32>
    %137 = arith.mulf %130, %136 : vector<1x256xf32>
    %138 = arith.addf %134, %137 : vector<1x256xf32>
    %139 = vector.broadcast %38 : f32 to vector<1x256xf32>
    %140 = arith.addf %138, %139 : vector<1x256xf32>
    %cst_85 = arith.constant 0.000000e+00 : f32
    %141 = vector.broadcast %cst_85 : f32 to vector<1x256xf32>
    %142 = arith.subf %141, %140 : vector<1x256xf32>
    %143 = math.exp %142 : vector<1x256xf32>
    %cst_86 = arith.constant 1.000000e+00 : f32
    %144 = vector.broadcast %cst_86 : f32 to vector<1x256xf32>
    %145 = arith.addf %144, %143 : vector<1x256xf32>
    %146 = tpu.reciprocal %145 : vector<1x256xf32> -> vector<1x256xf32>
    %147 = vector.broadcast %146 : vector<1x256xf32> to vector<24x256xf32>
    %148 = arith.mulf %43, %147 : vector<24x256xf32>
    %c0_87 = arith.constant 0 : index
    %c0_88 = arith.constant 0 : index
    %c0_89 = arith.constant 0 : index
    %149 = vector.load %arg9[%c0_87, %c0_88, %c0_89] : memref<2x24x256xf32, #tpu.memory_space<vmem>>, vector<1x24x256xf32>
    %150 = vector.shape_cast %149 : vector<1x24x256xf32> to vector<24x256xf32>
    %151 = vector.shape_cast %148 : vector<24x256xf32> to vector<1x24x256xf32>
    tpu.vector_store %arg9[%c0_87, %c0_88, %c0_89], %151 {strides = array<i32>} : memref<2x24x256xf32, #tpu.memory_space<vmem>>, vector<1x24x256xf32>,
    %c1_90 = arith.constant 1 : index
    %c0_91 = arith.constant 0 : index
    %c0_92 = arith.constant 0 : index
    %152 = vector.load %arg1[%c1_90, %c0_91, %c0_92] : memref<2x24x256xf32, #tpu.memory_space<vmem>>, vector<1x24x256xf32>
    %153 = vector.shape_cast %152 : vector<1x24x256xf32> to vector<24x256xf32>
    %154 = vector.extract_strided_slice %37 {offsets = [0, 1], sizes = [24, 1], strides = [1, 1]} : vector<24x2xf32> to vector<24x1xf32>
    %155 = vector.broadcast %154 : vector<24x1xf32> to vector<24x256xf32>
    %156 = arith.mulf %153, %155 : vector<24x256xf32>
    %cst_93 = arith.constant dense<0xFF800000> : vector<256xf32>
    %157 = vector.multi_reduction <maximumf>, %156, %cst_93 [0] : vector<24x256xf32> to vector<256xf32>
    %158 = vector.shape_cast %157 : vector<256xf32> to vector<1x256xf32>
    %cst_94 = arith.constant dense<0.000000e+00> : vector<256xf32>
    %159 = vector.multi_reduction <add>, %156, %cst_94 [0] : vector<24x256xf32> to vector<256xf32>
    %160 = vector.shape_cast %159 : vector<256xf32> to vector<1x256xf32>
    %cst_95 = arith.constant 0.0416666679 : f32
    %161 = vector.broadcast %cst_95 : f32 to vector<1x256xf32>
    %162 = arith.mulf %160, %161 : vector<1x256xf32>
    %cst_96 = arith.constant 0.000000e+00 : f32
    %163 = vector.broadcast %cst_96 : f32 to vector<1x256xf32>
    %c17_i32_97 = arith.constant 17 : i32
    %164 = tpu.dynamic_rotate %158 by %c17_i32_97 dim 1 : vector<1x256xf32>, i32 -> vector<1x256xf32>
    %c17_i32_98 = arith.constant 17 : i32
    %165 = tpu.dynamic_rotate %162 by %c17_i32_98 dim 1 : vector<1x256xf32>, i32 -> vector<1x256xf32>
    %c0_99 = arith.constant 0 : index
    %c0_100 = arith.constant 0 : index
    %c0_101 = arith.constant 0 : index
    %166 = vector.load %arg6[%c0_99, %c0_100, %c0_101] : memref<9x1x256xf32, #tpu.memory_space<vmem>>, vector<1x1x256xf32>
    %167 = vector.shape_cast %166 : vector<1x1x256xf32> to vector<1x256xf32>
    %168 = arith.mulf %164, %167 : vector<1x256xf32>
    %169 = arith.addf %163, %168 : vector<1x256xf32>
    %c0_102 = arith.constant 0 : index
    %c0_103 = arith.constant 0 : index
    %c0_104 = arith.constant 0 : index
    %170 = vector.load %arg7[%c0_102, %c0_103, %c0_104] : memref<9x1x256xf32, #tpu.memory_space<vmem>>, vector<1x1x256xf32>
    %171 = vector.shape_cast %170 : vector<1x1x256xf32> to vector<1x256xf32>
    %172 = arith.mulf %165, %171 : vector<1x256xf32>
    %173 = arith.addf %169, %172 : vector<1x256xf32>
    %c16_i32_105 = arith.constant 16 : i32
    %174 = tpu.dynamic_rotate %158 by %c16_i32_105 dim 1 : vector<1x256xf32>, i32 -> vector<1x256xf32>
    %c16_i32_106 = arith.constant 16 : i32
    %175 = tpu.dynamic_rotate %162 by %c16_i32_106 dim 1 : vector<1x256xf32>, i32 -> vector<1x256xf32>
    %c1_107 = arith.constant 1 : index
    %c0_108 = arith.constant 0 : index
    %c0_109 = arith.constant 0 : index
    %176 = vector.load %arg6[%c1_107, %c0_108, %c0_109] : memref<9x1x256xf32, #tpu.memory_space<vmem>>, vector<1x1x256xf32>
    %177 = vector.shape_cast %176 : vector<1x1x256xf32> to vector<1x256xf32>
    %178 = arith.mulf %174, %177 : vector<1x256xf32>
    %179 = arith.addf %173, %178 : vector<1x256xf32>
    %c1_110 = arith.constant 1 : index
    %c0_111 = arith.constant 0 : index
    %c0_112 = arith.constant 0 : index
    %180 = vector.load %arg7[%c1_110, %c0_111, %c0_112] : memref<9x1x256xf32, #tpu.memory_space<vmem>>, vector<1x1x256xf32>
    %181 = vector.shape_cast %180 : vector<1x1x256xf32> to vector<1x256xf32>
    %182 = arith.mulf %175, %181 : vector<1x256xf32>
    %183 = arith.addf %179, %182 : vector<1x256xf32>
    %c15_i32_113 = arith.constant 15 : i32
    %184 = tpu.dynamic_rotate %158 by %c15_i32_113 dim 1 : vector<1x256xf32>, i32 -> vector<1x256xf32>
    %c15_i32_114 = arith.constant 15 : i32
    %185 = tpu.dynamic_rotate %162 by %c15_i32_114 dim 1 : vector<1x256xf32>, i32 -> vector<1x256xf32>
    %c2_115 = arith.constant 2 : index
    %c0_116 = arith.constant 0 : index
    %c0_117 = arith.constant 0 : index
    %186 = vector.load %arg6[%c2_115, %c0_116, %c0_117] : memref<9x1x256xf32, #tpu.memory_space<vmem>>, vector<1x1x256xf32>
    %187 = vector.shape_cast %186 : vector<1x1x256xf32> to vector<1x256xf32>
    %188 = arith.mulf %184, %187 : vector<1x256xf32>
    %189 = arith.addf %183, %188 : vector<1x256xf32>
    %c2_118 = arith.constant 2 : index
    %c0_119 = arith.constant 0 : index
    %c0_120 = arith.constant 0 : index
    %190 = vector.load %arg7[%c2_118, %c0_119, %c0_120] : memref<9x1x256xf32, #tpu.memory_space<vmem>>, vector<1x1x256xf32>
    %191 = vector.shape_cast %190 : vector<1x1x256xf32> to vector<1x256xf32>
    %192 = arith.mulf %185, %191 : vector<1x256xf32>
    %193 = arith.addf %189, %192 : vector<1x256xf32>
    %c1_i32_121 = arith.constant 1 : i32
    %194 = tpu.dynamic_rotate %158 by %c1_i32_121 dim 1 : vector<1x256xf32>, i32 -> vector<1x256xf32>
    %c1_i32_122 = arith.constant 1 : i32
    %195 = tpu.dynamic_rotate %162 by %c1_i32_122 dim 1 : vector<1x256xf32>, i32 -> vector<1x256xf32>
    %c3_123 = arith.constant 3 : index
    %c0_124 = arith.constant 0 : index
    %c0_125 = arith.constant 0 : index
    %196 = vector.load %arg6[%c3_123, %c0_124, %c0_125] : memref<9x1x256xf32, #tpu.memory_space<vmem>>, vector<1x1x256xf32>
    %197 = vector.shape_cast %196 : vector<1x1x256xf32> to vector<1x256xf32>
    %198 = arith.mulf %194, %197 : vector<1x256xf32>
    %199 = arith.addf %193, %198 : vector<1x256xf32>
    %c3_126 = arith.constant 3 : index
    %c0_127 = arith.constant 0 : index
    %c0_128 = arith.constant 0 : index
    %200 = vector.load %arg7[%c3_126, %c0_127, %c0_128] : memref<9x1x256xf32, #tpu.memory_space<vmem>>, vector<1x1x256xf32>
    %201 = vector.shape_cast %200 : vector<1x1x256xf32> to vector<1x256xf32>
    %202 = arith.mulf %195, %201 : vector<1x256xf32>
    %203 = arith.addf %199, %202 : vector<1x256xf32>
    %c4_129 = arith.constant 4 : index
    %c0_130 = arith.constant 0 : index
    %c0_131 = arith.constant 0 : index
    %204 = vector.load %arg6[%c4_129, %c0_130, %c0_131] : memref<9x1x256xf32, #tpu.memory_space<vmem>>, vector<1x1x256xf32>
    %205 = vector.shape_cast %204 : vector<1x1x256xf32> to vector<1x256xf32>
    %206 = arith.mulf %158, %205 : vector<1x256xf32>
    %207 = arith.addf %203, %206 : vector<1x256xf32>
    %c4_132 = arith.constant 4 : index
    %c0_133 = arith.constant 0 : index
    %c0_134 = arith.constant 0 : index
    %208 = vector.load %arg7[%c4_132, %c0_133, %c0_134] : memref<9x1x256xf32, #tpu.memory_space<vmem>>, vector<1x1x256xf32>
    %209 = vector.shape_cast %208 : vector<1x1x256xf32> to vector<1x256xf32>
    %210 = arith.mulf %162, %209 : vector<1x256xf32>
    %211 = arith.addf %207, %210 : vector<1x256xf32>
    %c255_i32_135 = arith.constant 255 : i32
    %212 = tpu.dynamic_rotate %158 by %c255_i32_135 dim 1 : vector<1x256xf32>, i32 -> vector<1x256xf32>
    %c255_i32_136 = arith.constant 255 : i32
    %213 = tpu.dynamic_rotate %162 by %c255_i32_136 dim 1 : vector<1x256xf32>, i32 -> vector<1x256xf32>
    %c5_137 = arith.constant 5 : index
    %c0_138 = arith.constant 0 : index
    %c0_139 = arith.constant 0 : index
    %214 = vector.load %arg6[%c5_137, %c0_138, %c0_139] : memref<9x1x256xf32, #tpu.memory_space<vmem>>, vector<1x1x256xf32>
    %215 = vector.shape_cast %214 : vector<1x1x256xf32> to vector<1x256xf32>
    %216 = arith.mulf %212, %215 : vector<1x256xf32>
    %217 = arith.addf %211, %216 : vector<1x256xf32>
    %c5_140 = arith.constant 5 : index
    %c0_141 = arith.constant 0 : index
    %c0_142 = arith.constant 0 : index
    %218 = vector.load %arg7[%c5_140, %c0_141, %c0_142] : memref<9x1x256xf32, #tpu.memory_space<vmem>>, vector<1x1x256xf32>
    %219 = vector.shape_cast %218 : vector<1x1x256xf32> to vector<1x256xf32>
    %220 = arith.mulf %213, %219 : vector<1x256xf32>
    %221 = arith.addf %217, %220 : vector<1x256xf32>
    %c241_i32_143 = arith.constant 241 : i32
    %222 = tpu.dynamic_rotate %158 by %c241_i32_143 dim 1 : vector<1x256xf32>, i32 -> vector<1x256xf32>
    %c241_i32_144 = arith.constant 241 : i32
    %223 = tpu.dynamic_rotate %162 by %c241_i32_144 dim 1 : vector<1x256xf32>, i32 -> vector<1x256xf32>
    %c6_145 = arith.constant 6 : index
    %c0_146 = arith.constant 0 : index
    %c0_147 = arith.constant 0 : index
    %224 = vector.load %arg6[%c6_145, %c0_146, %c0_147] : memref<9x1x256xf32, #tpu.memory_space<vmem>>, vector<1x1x256xf32>
    %225 = vector.shape_cast %224 : vector<1x1x256xf32> to vector<1x256xf32>
    %226 = arith.mulf %222, %225 : vector<1x256xf32>
    %227 = arith.addf %221, %226 : vector<1x256xf32>
    %c6_148 = arith.constant 6 : index
    %c0_149 = arith.constant 0 : index
    %c0_150 = arith.constant 0 : index
    %228 = vector.load %arg7[%c6_148, %c0_149, %c0_150] : memref<9x1x256xf32, #tpu.memory_space<vmem>>, vector<1x1x256xf32>
    %229 = vector.shape_cast %228 : vector<1x1x256xf32> to vector<1x256xf32>
    %230 = arith.mulf %223, %229 : vector<1x256xf32>
    %231 = arith.addf %227, %230 : vector<1x256xf32>
    %c240_i32_151 = arith.constant 240 : i32
    %232 = tpu.dynamic_rotate %158 by %c240_i32_151 dim 1 : vector<1x256xf32>, i32 -> vector<1x256xf32>
    %c240_i32_152 = arith.constant 240 : i32
    %233 = tpu.dynamic_rotate %162 by %c240_i32_152 dim 1 : vector<1x256xf32>, i32 -> vector<1x256xf32>
    %c7_153 = arith.constant 7 : index
    %c0_154 = arith.constant 0 : index
    %c0_155 = arith.constant 0 : index
    %234 = vector.load %arg6[%c7_153, %c0_154, %c0_155] : memref<9x1x256xf32, #tpu.memory_space<vmem>>, vector<1x1x256xf32>
    %235 = vector.shape_cast %234 : vector<1x1x256xf32> to vector<1x256xf32>
    %236 = arith.mulf %232, %235 : vector<1x256xf32>
    %237 = arith.addf %231, %236 : vector<1x256xf32>
    %c7_156 = arith.constant 7 : index
    %c0_157 = arith.constant 0 : index
    %c0_158 = arith.constant 0 : index
    %238 = vector.load %arg7[%c7_156, %c0_157, %c0_158] : memref<9x1x256xf32, #tpu.memory_space<vmem>>, vector<1x1x256xf32>
    %239 = vector.shape_cast %238 : vector<1x1x256xf32> to vector<1x256xf32>
    %240 = arith.mulf %233, %239 : vector<1x256xf32>
    %241 = arith.addf %237, %240 : vector<1x256xf32>
    %c239_i32_159 = arith.constant 239 : i32
    %242 = tpu.dynamic_rotate %158 by %c239_i32_159 dim 1 : vector<1x256xf32>, i32 -> vector<1x256xf32>
    %c239_i32_160 = arith.constant 239 : i32
    %243 = tpu.dynamic_rotate %162 by %c239_i32_160 dim 1 : vector<1x256xf32>, i32 -> vector<1x256xf32>
    %c8_161 = arith.constant 8 : index
    %c0_162 = arith.constant 0 : index
    %c0_163 = arith.constant 0 : index
    %244 = vector.load %arg6[%c8_161, %c0_162, %c0_163] : memref<9x1x256xf32, #tpu.memory_space<vmem>>, vector<1x1x256xf32>
    %245 = vector.shape_cast %244 : vector<1x1x256xf32> to vector<1x256xf32>
    %246 = arith.mulf %242, %245 : vector<1x256xf32>
    %247 = arith.addf %241, %246 : vector<1x256xf32>
    %c8_164 = arith.constant 8 : index
    %c0_165 = arith.constant 0 : index
    %c0_166 = arith.constant 0 : index
    %248 = vector.load %arg7[%c8_164, %c0_165, %c0_166] : memref<9x1x256xf32, #tpu.memory_space<vmem>>, vector<1x1x256xf32>
    %249 = vector.shape_cast %248 : vector<1x1x256xf32> to vector<1x256xf32>
    %250 = arith.mulf %243, %249 : vector<1x256xf32>
    %251 = arith.addf %247, %250 : vector<1x256xf32>
    %252 = vector.broadcast %38 : f32 to vector<1x256xf32>
    %253 = arith.addf %251, %252 : vector<1x256xf32>
    %cst_167 = arith.constant 0.000000e+00 : f32
    %254 = vector.broadcast %cst_167 : f32 to vector<1x256xf32>
    %255 = arith.subf %254, %253 : vector<1x256xf32>
    %256 = math.exp %255 : vector<1x256xf32>
    %cst_168 = arith.constant 1.000000e+00 : f32
    %257 = vector.broadcast %cst_168 : f32 to vector<1x256xf32>
    %258 = arith.addf %257, %256 : vector<1x256xf32>
    %259 = tpu.reciprocal %258 : vector<1x256xf32> -> vector<1x256xf32>
    %260 = vector.broadcast %259 : vector<1x256xf32> to vector<24x256xf32>
    %261 = arith.mulf %156, %260 : vector<24x256xf32>
    %c1_169 = arith.constant 1 : index
    %c0_170 = arith.constant 0 : index
    %c0_171 = arith.constant 0 : index
    %262 = vector.load %arg9[%c1_169, %c0_170, %c0_171] : memref<2x24x256xf32, #tpu.memory_space<vmem>>, vector<1x24x256xf32>
    %263 = vector.shape_cast %262 : vector<1x24x256xf32> to vector<24x256xf32>
    %264 = vector.shape_cast %261 : vector<24x256xf32> to vector<1x24x256xf32>
    tpu.vector_store %arg9[%c1_169, %c0_170, %c0_171], %264 {strides = array<i32>} : memref<2x24x256xf32, #tpu.memory_space<vmem>>, vector<1x24x256xf32>,
    return
  }
  func.func @transform_0(%arg0: i32) -> (i32, i32, i32) {
    %c0_i32 = arith.constant 0 : i32
    %c0_i32_0 = arith.constant 0 : i32
    %c0_i32_1 = arith.constant 0 : i32
    return %arg0, %c0_i32, %c0_i32_0 : i32, i32, i32
  }
  func.func @transform_1(%arg0: i32) -> (i32, i32) {
    %c0_i32 = arith.constant 0 : i32
    %c0_i32_0 = arith.constant 0 : i32
    %c0_i32_1 = arith.constant 0 : i32
    return %c0_i32, %c0_i32_0 : i32, i32
  }
  func.func @transform_2(%arg0: i32) -> (i32, i32) {
    %c0_i32 = arith.constant 0 : i32
    %c0_i32_0 = arith.constant 0 : i32
    %c0_i32_1 = arith.constant 0 : i32
    return %c0_i32, %c0_i32_0 : i32, i32
  }
  func.func @transform_3(%arg0: i32) -> (i32, i32) {
    %c0_i32 = arith.constant 0 : i32
    %c0_i32_0 = arith.constant 0 : i32
    %c0_i32_1 = arith.constant 0 : i32
    return %c0_i32, %c0_i32_0 : i32, i32
  }
  func.func @transform_4(%arg0: i32) -> (i32, i32) {
    %c0_i32 = arith.constant 0 : i32
    %c0_i32_0 = arith.constant 0 : i32
    %c0_i32_1 = arith.constant 0 : i32
    return %c0_i32, %c0_i32_0 : i32, i32
  }
  func.func @transform_5(%arg0: i32) -> (i32, i32, i32) {
    %c0_i32 = arith.constant 0 : i32
    %c0_i32_0 = arith.constant 0 : i32
    %c0_i32_1 = arith.constant 0 : i32
    %c0_i32_2 = arith.constant 0 : i32
    return %c0_i32, %c0_i32_0, %c0_i32_1 : i32, i32, i32
  }
  func.func @transform_6(%arg0: i32) -> (i32, i32, i32) {
    %c0_i32 = arith.constant 0 : i32
    %c0_i32_0 = arith.constant 0 : i32
    %c0_i32_1 = arith.constant 0 : i32
    %c0_i32_2 = arith.constant 0 : i32
    return %c0_i32, %c0_i32_0, %c0_i32_1 : i32, i32, i32
  }
  func.func @transform_7(%arg0: i32) -> i32 {
    %c0_i32 = arith.constant 0 : i32
    %c0_i32_0 = arith.constant 0 : i32
    return %c0_i32 : i32
  }
  func.func @transform_8(%arg0: i32) -> (i32, i32, i32) {
    %c0_i32 = arith.constant 0 : i32
    %c0_i32_0 = arith.constant 0 : i32
    %c0_i32_1 = arith.constant 0 : i32
    return %arg0, %c0_i32, %c0_i32_0 : i32, i32, i32
  }
}

</mosaic_0001>

<bundles_post_ra>
// kernel: tpu_custom_call.1
= control target key start
LH: loop header
LB: loop body
LE: loop exit
PB: predicated region body
PF: predicated region fallthrough
CT: control target
= control target key end

     0   :  { %14 = vsyncpa [#allocation4], 0  ;;  %s2535_s0 = inlined_call_operand.hbm [shape: f32[2,24,256], index: 0, kind: input, shape index: {}]   ;;  %s2536_s1 = inlined_call_operand.vmem [shape: f32[2,24], index: 1, kind: input, shape index: {}]   ;;  %s2537_s2 = inlined_call_operand.vmem [shape: f32[2,1], index: 2, kind: input, shape index: {}]   ;;  %s2538_s3 = inlined_call_operand.vmem [shape: f32[24,2], index: 3, kind: input, shape index: {}]   ;;  %s2539_s4 = inlined_call_operand.vmem [shape: f32[24,1], index: 4, kind: input, shape index: {}]   ;;  %s2540_s5 = inlined_call_operand.vmem [shape: f32[9,1,256], index: 5, kind: input, shape index: {}]   ;;  %s2541_s6 = inlined_call_operand.vmem [shape: f32[9,1,256], index: 6, kind: input, shape index: {}]   ;;  %s2542_s7 = inlined_call_operand.<no memory space> [shape: f32[1], index: 7, kind: input, shape index: {}]   ;;  %s2543_s8 = inlined_call_operand.hbm [shape: f32[2,24,256], index: 8, kind: output, shape index: {}]  }
   0x1   :  { %15 = vsyncpa [#allocation5], 0  ;;  %s1495_s27 = smov [#allocation3]   ;;  %s1447_s9 = scalar_lea.hbm %s2535_s0, 1536 }
   0x2   :  { %s21_s28 = sshll.u32 %s1495_s27, 4  ;;  %p1448_p0 = scmp.ne.s32.totalorder %s2535_s0, %s1447_s9  ;;  %s22_s28 = int_to_ptr.vmem [resolvable:$true] %s21_s28 }
   0x3   :  { %p1451_p1 = scmp.lt.u32.totalorder %s1447_s9, %s2535_s0 }
   0x5   :  { %p1453_p2 = pnand %p1451_p1, %p1448_p0 }
   0x7   :  { %1456 = shalt.err (!%p1453_p2)
}
   0x8   :  { %s1457_s14 = scalar_lea.vmem %s22_s28, 1536  ;;  %p1462_p4 = scmp.lt.s32.totalorder %s22_s28, %s22_s28 }
   0x9   :  { %p1458_p3 = scmp.ne.s32.totalorder %s22_s28, %s1457_s14  ;;  %p1463_p5 = scmp.lt.s32.totalorder %s1457_s14, %s1457_s14 }
   0xb   :  { %p1464_p6 = por %p1463_p5, %p1462_p4 }
   0xd   :  { %p1465_p7 = pnand %p1464_p6, %p1458_p3 }
   0xf   :  { %1468 = shalt.err (!%p1465_p7)
}
  0x10   :  { %s1496_s15 = smov 256   ;;  %s1497_s16 = smov 16  }
  0x11   :  { %27 = dma.hbm_to_vmem [thread:$0]  %s2535_s0, 1536, %s22_s28, [#allocation4], %s1496_s15, %s1496_s15, %s1497_s16  }
  0x12   :  { %1491 = dma.done.wait [#allocation4], 1536  }
  0x13   :  { %1492 = vsyncadd [#allocation4], 4294965760  ;;  %v1572_v0 = vld [vmem:[#allocation3 + $0x30] sm:$0xff]  ;;  %v1574_v1 = vld [vmem:[#allocation3 + $0x38] sm:$0xff]  ;;  %v1498_v24 = vmov 0.0|0.0   ;;  %v1499_v25 = vmov 0.0  }
  0x14   :  { %v1576_v2 = vld [vmem:[#allocation3] sm:$0xff]  ;;  %v79_v3 = vadd.f32 %v1574_v1, %v1572_v0  ;;  %v1580_v4 = vld [vmem:[#allocation3 + $0x8] sm:$0xff]  ;;  %v1588_v8 = vld [vmem:[#allocation3 + $0x10] sm:$0xff]  ;;  %v91_v15 = vmax.f32 %v1572_v0, %v1574_v1  ;;  %1394 = vmatprep.subr.bf16.mxu0 %v1498_v24  ;;  %1383 = vmatprep.subr.mxu1 %v1499_v25  ;;  %vm1500_vm0 = vmmov 0   ;;  %v1501_v26 = vmov 0   ;;  %s1502_s9 = smov 126  }
  0x15   :  { %v1582_v5 = vld [vmem:[#allocation3 + $0x40] sm:$0xff]  ;;  %v1584_v6 = vld [vmem:[#allocation3 + $0x48] sm:$0xff]  ;;  %v51_v7 = vadd.f32 %v1580_v4, %v1576_v2  ;;  %v1590_v9 = vld [vmem:[#allocation3 + $0x18] sm:$0xff]  ;;  %v63_v13 = vmax.f32 %v1576_v2, %v1580_v4  ;;  %1380 = vmatprep.mubr.msk.f32.mxu0 %vm1500_vm0, %v1499_v25  ;;  %1385 = vmatprep.mubr.msk.f32.mxu1 %vm1500_vm0, %v1499_v25  ;;  %vm100_vm1 = vcmask 7168   ;;  %vm104_vm2 = vcmask 15360   ;;  %s1505_s10 = smov 15  }
  0x16   :  { %80 = vadd.xlane.f32.xlu1 %v79_v3  ;;  %v82_v10 = vadd.f32 %v1584_v6, %v1582_v5  ;;  %v54_v11 = vadd.f32 %v1590_v9, %v1588_v8  ;;  %v66_v12 = vmax.f32 %v1588_v8, %v1590_v9  ;;  %v94_v14 = vmax.f32 %v1582_v5, %v1584_v6  ;;  %v1604_v16 = vld [vmem:[#allocation3 + $0x50] sm:$0xff]  ;;  %v1606_v17 = vld [vmem:[#allocation3 + $0x58] sm:$0xff]  ;;  %v1608_v18 = vld [vmem:[#allocation3 + $0x20] sm:$0xff]  ;;  %s1506_s11 = smov 1   ;;  %s1507_s12 = smov 127  }
  0x17   :  { %52 = vadd.xlane.f32.xlu0 %v51_v7  ;;  %v1610_v19 = vld [vmem:[#allocation3 + $0x28] sm:$0xff]  ;;  %v85_v20 = vadd.f32 %v1606_v17, %v1604_v16  ;;  %v97_v22 = vmax.f32 %v1604_v16, %v1606_v17  ;;  %1415 = vset.pattern.permute.xlu1 %v1501_v26  ;;  %v113_v27 = vld [vmem:[%s2537_s2] sm:$0x3]  ;;  %vm108_vm3 = vcmask 23552   ;;  %vm119_vm4 = vcmask 195584   ;;  %v199_v59 = vld [vmem:[%s2539_s4 + $0x10] sm:$0xff] }
  0x18   :  { %v57_v21 = vadd.f32 %v1610_v19, %v1608_v18  ;;  %v69_v23 = vmax.f32 %v1608_v18, %v1610_v19  ;;  %1414 = vset.pattern.permute.xlu0 %v1501_v26  ;;  %v112_v55 = vld [vmem:[%s2536_s1] sm:$0x3]  ;;  %v198_v58 = vld [vmem:[%s2539_s4 + $0x8] sm:$0xff]  ;;  %vm224_vm5 = vcmask 1041408   ;;  %s1508_s13 = smov 113   ;;  %s1509_s14 = smov 112  }
  0x19   :  { %v197_v57 = vld [vmem:[%s2539_s4] sm:$0xff]  ;;  %s1510_s17 = smov 111  }
  0x1a   :  { %83 = vadd.xlane.f32.xlu1 %v82_v10  ;;  %v194_v7 = vld [vmem:[%s2538_s3] sm:$0xff]  ;;  %v195_v10 = vld [vmem:[%s2538_s3 + $0x8] sm:$0xff] }
  0x1b   :  { %55 = vadd.xlane.f32.xlu0 %v54_v11  ;;  %v196_v11 = vld [vmem:[%s2538_s3 + $0x10] sm:$0xff]  ;;  %s1504_s3 = smov 17  }
  0x1e   :  { %67 = vmax.xlane.f32.xlu1 %v66_v12 }
  0x1f   :  { %64 = vmax.xlane.f32.xlu0 %v63_v13 }
  0x22   :  { %95 = vmax.xlane.f32.xlu1 %v94_v14 }
  0x23   :  { %92 = vmax.xlane.f32.xlu0 %v91_v15 }
  0x26   :  { %86 = vadd.xlane.f32.xlu1 %v85_v20 }
  0x27   :  { %58 = vadd.xlane.f32.xlu0 %v57_v21 }
  0x2a   :  { %98 = vmax.xlane.f32.xlu1 %v97_v22 }
  0x2b   :  { %70 = vmax.xlane.f32.xlu0 %v69_v23 }
  0x3b   :  { %202 = vperm.xlu1 %1415, %v197_v57  }
  0x3f   :  { %207 = vperm.xlu1 %1415, %v198_v58  }
  0x41   :  { %116 = vperm.xlu0 %1414, %v113_v27  }
  0x43   :  { %212 = vperm.xlu1 %1415, %v199_v59  }
  0xa3   :  { %v81_v28 = vpop.xlane.xlu1 %80 }
  0xa4   :  { %v53_v29 = vpop.xlane.xlu0 %52  ;;  %v88_v34 = vmul.f32 0.00390625, %v81_v28 }
  0xa5   :  { %v60_v35 = vmul.f32 0.00390625, %v53_v29  ;;  %v1503_v29 = vmov 1  }
  0xa6   :  { %1416 = vset.pattern.permute.xlu0 %v1503_v29 }
  0xa7   :  { %v84_v30 = vpop.xlane.xlu1 %83  ;;  %v101_v40 = vsel %vm100_vm1, %v60_v35, %v88_v34 }
  0xa8   :  { %v89_v31 = vmul.f32 0.00390625, %v84_v30  ;;  %v56_v32 = vpop.xlane.xlu0 %55 }
  0xa9   :  { %v61_v33 = vmul.f32 0.00390625, %v56_v32 }
  0xab   :  { %v68_v36 = vpop.xlane.xlu1 %67  ;;  %v102_v37 = vsel %vm100_vm1, %v61_v33, %v89_v31 }
  0xac   :  { %v65_v38 = vpop.xlane.xlu0 %64  ;;  %v106_v39 = vsel %vm104_vm2, %v102_v37, %v68_v36 }
  0xad   :  { %v105_v42 = vsel %vm104_vm2, %v101_v40, %v65_v38 }
  0xaf   :  { %v96_v41 = vpop.xlane.xlu1 %95 }
  0xb0   :  { %v110_v43 = vsel %vm108_vm3, %v106_v39, %v96_v41  ;;  %v93_v44 = vpop.xlane.xlu0 %92 }
  0xb1   :  { %v109_v45 = vsel %vm108_vm3, %v105_v42, %v93_v44 }
  0xb2   :  { %v1395_v46 = vpack.c.bf16 %v110_v43, %v109_v45 }
  0xb3   :  { %v87_v47 = vpop.xlane.xlu1 %86 }
  0xb4   :  { %v90_v48 = vmul.f32 0.00390625, %v87_v47  ;;  %1396 = vmatpush3.bf16.msra.mxu0 %v1395_v46  ;;  %v59_v49 = vpop.xlane.xlu0 %58 }
  0xb5   :  { %v62_v50 = vmul.f32 0.00390625, %v59_v49  ;;  %1378 = vmatprep.subr.mxu0 %v1499_v25 }
  0xb7   :  { %v103_v51 = vsel %vm100_vm1, %v62_v50, %v90_v48  ;;  %v99_v52 = vpop.xlane.xlu1 %98 }
  0xb8   :  { %v71_v53 = vpop.xlane.xlu0 %70 }
  0xb9   :  { %v107_v54 = vsel %vm104_vm2, %v103_v51, %v71_v53 }
  0xba   :  { %v111_v56 = vsel %vm108_vm3, %v107_v54, %v99_v52 }
  0xbb   :  { %1379 = vmatpush3.msra.mxu0 %v111_v56  ;;  %v203_v12 = vpop.permute.xlu1 %202 }
  0xbc   :  { %1381 = vmatmul.mubr.msk.f32.vlgmr.msra.gmra.mrb[0].mxu0 %vm119_vm4, %v112_v55 }
  0xbf   :  { %v208_v20 = vpop.permute.xlu1 %207 }
  0xc0   :  { %v117_v60 = vpop.permute.xlu0 %116 }
  0xc3   :  { %v213_v24 = vpop.permute.xlu1 %212 }
 0x18f   :  { %v189_v61 = vpop.f32.mrb[0].mxu0 }
 0x190   :  { %v190_v62 = vadd.f32 %v189_v61, %v117_v60  ;;  %v1382_v63 = vpop.f32.mrb[1].mxu0 }
 0x192   :  { %v193_v3 = vmax.f32 %v190_v62, 0.0 }
 0x194   :  { %1384 = vmatpush3.msk.msra.mxu1 %vm224_vm5, %v193_v3 }
 0x195   :  { %1386 = vmatmul.mubr.msk.f32.vlgmr.msra.gmra.mrb[0].mxu1 %vm104_vm2, %v194_v7 }
 0x196   :  { %1388 = vmatprep.mubr.msk.f32.mxu1 %vm1500_vm0, %v1499_v25 }
 0x199   :  { %1389 = vmatmul.mubr.msk.f32.gmra.mrb[2].mxu1 %vm104_vm2, %v195_v10 }
 0x19a   :  { %1391 = vmatprep.mubr.msk.f32.mxu1 %vm1500_vm0, %v1499_v25 }
 0x19d   :  { %1392 = vmatmul.mubr.msk.f32.gmra.mrb[4].mxu1 %vm104_vm2, %v196_v11 }
 0x268   :  { %v294_v13 = vpop.f32.mrb[0].mxu1 }
 0x269   :  { %v295_v14 = vadd.f32 %v294_v13, %v203_v12  ;;  %v1387_v15 = vpop.f32.mrb[1].mxu1 }
 0x26b   :  { %311 = vrot.lane.b32.xlu1 %v295_v14, %s1502_s9 }
 0x26c   :  { %v299_v21 = vpop.f32.mrb[2].mxu1 }
 0x26d   :  { %v300_v22 = vadd.f32 %v299_v21, %v208_v20  ;;  %v1390_v23 = vpop.f32.mrb[3].mxu1 }
 0x26f   :  { %313 = vrot.lane.b32.xlu1 %v300_v22, %s1502_s9 }
 0x270   :  { %v304_v27 = vpop.f32.mrb[4].mxu1 }
 0x271   :  { %v305_v25 = vadd.f32 %v304_v27, %v213_v24  ;;  %v1393_v28 = vpop.f32.mrb[5].mxu1 }
 0x273   :  { %315 = vrot.lane.b32.xlu1 %v305_v25, %s1502_s9 }
 0x2dd   :  { %v312_v30 = vpop.permute.xlu1 %311 }
 0x2de   :  { %v320_v31 = vadd.f32 %v312_v30, %v295_v14 }
 0x2e0   :  { %v323_v32 = vsub.f32 0.0, %v320_v31 }
 0x2e1   :  { %v314_v33 = vpop.permute.xlu1 %313 }
 0x2e2   :  { %v326_v34 = vmul.f32 1.442695, %v323_v32  ;;  %v321_v35 = vadd.f32 %v314_v33, %v300_v22 }
 0x2e4   :  { %1419 = vpow2.f32 %v326_v34  ;;  %v324_v36 = vsub.f32 0.0, %v321_v35 }
 0x2e5   :  { %v316_v37 = vpop.permute.xlu1 %315 }
 0x2e6   :  { %v328_v38 = vmul.f32 1.442695, %v324_v36  ;;  %v322_v39 = vadd.f32 %v316_v37, %v305_v25 }
 0x2e8   :  { %1421 = vpow2.f32 %v328_v38  ;;  %v325_v40 = vsub.f32 0.0, %v322_v39 }
 0x2ea   :  { %v330_v41 = vmul.f32 1.442695, %v325_v40 }
 0x2ec   :  { %1423 = vpow2.f32 %v330_v41 }
 0x2ee   :  { %v1420_v42 = vpop.eup %1419 }
 0x2ef   :  { %v332_v43 = vadd.f32 1.0, %v1420_v42 }
 0x2f1   :  { %1425 = vrcp.f32 %v332_v43 }
 0x2f2   :  { %v1422_v44 = vpop.eup %1421 }
 0x2f3   :  { %v333_v45 = vadd.f32 1.0, %v1422_v44 }
 0x2f5   :  { %1427 = vrcp.f32 %v333_v45 }
 0x2f6   :  { %v1424_v46 = vpop.eup %1423 }
 0x2f7   :  { %v334_v47 = vadd.f32 1.0, %v1424_v46 }
 0x2f9   :  { %1429 = vrcp.f32 %v334_v47 }
 0x2fb   :  { %v1426_v48 = vpop.eup %1425 }
 0x2fc   :  { %844 = vperm.xlu0 %1416, %v1426_v48   ;;  %341 = vperm.xlu1 %1415, %v1426_v48  }
 0x2ff   :  { %v1428_v49 = vpop.eup %1427 }
 0x300   :  { %346 = vperm.xlu1 %1415, %v1428_v49  }
 0x303   :  { %v1430_v50 = vpop.eup %1429 }
 0x304   :  { %1417 = vset.pattern.permute.xlu1 %v1503_v29  ;;  %852 = vperm.xlu0 %1416, %v1430_v50  }
 0x305   :  { %848 = vperm.xlu1 %1417, %v1428_v49  }
 0x309   :  { %1418 = vset.pattern.permute.xlu1 %v1501_v26 }
 0x30a   :  { %351 = vperm.xlu1 %1418, %v1430_v50  }
 0x37b   :  { %v342_v51 = vpop.permute.xlu1 %341  ;;  %v845_v52 = vpop.permute.xlu0 %844 }
 0x37c   :  { %v1670_v55 = vmul.f32 %v845_v52, %v1572_v0  ;;  %v1673_v56 = vmul.f32 %v845_v52, %v1574_v1  ;;  %v1704_v63 = vmul.f32 %v342_v51, %v1576_v2  ;;  %v1707_v3 = vmul.f32 %v342_v51, %v1580_v4 }
 0x37e   :  { %2560 = vst [vmem:[#allocation9_spill] sm:$0xff] %v1670_v55  ;;  %2561 = vst [vmem:[#allocation10_spill] sm:$0xff] %v1673_v56 }
 0x37f   :  { %v347_v53 = vpop.permute.xlu1 %346  ;;  %2568 = vst [vmem:[#allocation17_spill] sm:$0xff] %v1704_v63  ;;  %2569 = vst [vmem:[#allocation18_spill] sm:$0xff] %v1707_v3 }
 0x380   :  { %v1692_v61 = vmul.f32 %v347_v53, %v1588_v8 }
 0x382   :  { %2566 = vst [vmem:[#allocation15_spill] sm:$0xff] %v1692_v61  ;;  %v376_v12 = vadd.f32 %v1692_v61, %v1704_v63 }
 0x383   :  { %v853_v54 = vpop.permute.xlu0 %852 }
 0x384   :  { %v1676_v57 = vmul.f32 %v853_v54, %v1604_v16  ;;  %v1679_v58 = vmul.f32 %v853_v54, %v1606_v17  ;;  %v849_v59 = vpop.permute.xlu1 %848  ;;  %v1695_v16 = vmul.f32 %v347_v53, %v1590_v9 }
 0x385   :  { %v1682_v26 = vmul.f32 %v849_v59, %v1582_v5  ;;  %v1685_v60 = vmul.f32 %v849_v59, %v1584_v6 }
 0x386   :  { %2562 = vst [vmem:[#allocation11_spill] sm:$0xff] %v1676_v57  ;;  %2563 = vst [vmem:[#allocation12_spill] sm:$0xff] %v1679_v58  ;;  %v861_v0 = vmax.f32 %v1670_v55, %v1676_v57  ;;  %v869_v1 = vmax.f32 %v1673_v56, %v1679_v58  ;;  %v384_v2 = vadd.f32 %v1695_v16, %v1707_v3 }
 0x387   :  { %2564 = vst [vmem:[#allocation13_spill] sm:$0xff] %v1682_v26  ;;  %2565 = vst [vmem:[#allocation14_spill] sm:$0xff] %v1685_v60  ;;  %v877_v17 = vadd.f32 %v1682_v26, %v1670_v55  ;;  %v885_v5 = vadd.f32 %v1685_v60, %v1673_v56 }
 0x388   :  { %2567 = vst [vmem:[#allocation16_spill] sm:$0xff] %v1695_v16  ;;  %v862_v6 = vmax.f32 %v861_v0, %v1682_v26  ;;  %v870_v62 = vmax.f32 %v869_v1, %v1685_v60  ;;  %v2071_v26 = vld [vmem:[%s2540_s5 + $0xa] sm:$0x3] }
 0x389   :  { %v878_v8 = vadd.f32 %v877_v17, %v1676_v57  ;;  %v886_v9 = vadd.f32 %v885_v5, %v1679_v58  ;;  %v352_v7 = vpop.permute.xlu1 %351 }
 0x38a   :  { %v1712_v10 = vmul.f32 %v352_v7, %v1608_v18  ;;  %v1715_v11 = vmul.f32 %v352_v7, %v1610_v19  ;;  %v863_v13 = vrot.slane %v862_v6, 4  ;;  %v871_v4 = vrot.slane %v870_v62, 4 }
 0x38b   :  { %v879_v20 = vrot.slane %v878_v8, 4  ;;  %v887_v18 = vrot.slane %v886_v9, 4 }
 0x38c   :  { %2570 = vst [vmem:[#allocation19_spill] sm:$0xff] %v1712_v10  ;;  %2571 = vst [vmem:[#allocation20_spill] sm:$0xff] %v1715_v11  ;;  %v360_v14 = vmax.f32 %v1704_v63, %v1712_v10  ;;  %v368_v15 = vmax.f32 %v1707_v3, %v1715_v11  ;;  %v377_v21 = vadd.f32 %v376_v12, %v1712_v10 }
 0x38d   :  { %v385_v19 = vadd.f32 %v384_v2, %v1715_v11  ;;  %v864_v25 = vmax.f32 %v862_v6, %v863_v13  ;;  %v872_v28 = vmax.f32 %v870_v62, %v871_v4  ;;  %v880_v31 = vadd.f32 %v879_v20, %v878_v8 }
 0x38e   :  { %v361_v22 = vmax.f32 %v360_v14, %v1692_v61  ;;  %v369_v23 = vmax.f32 %v368_v15, %v1695_v16  ;;  %v378_v24 = vrot.slane %v377_v21, 4  ;;  %v888_v32 = vadd.f32 %v887_v18, %v886_v9 }
 0x38f   :  { %v386_v27 = vrot.slane %v385_v19, 4  ;;  %v865_v39 = vrot.slane %v864_v25, 2  ;;  %v873_v40 = vrot.slane %v872_v28, 2  ;;  %v881_v43 = vrot.slane %v880_v31, 2 }
 0x390   :  { %v362_v29 = vrot.slane %v361_v22, 4  ;;  %v370_v30 = vrot.slane %v369_v23, 4  ;;  %v379_v33 = vadd.f32 %v378_v24, %v377_v21  ;;  %v889_v44 = vrot.slane %v888_v32, 2 }
 0x391   :  { %v387_v34 = vadd.f32 %v386_v27, %v385_v19  ;;  %v866_v53 = vmax.f32 %v864_v25, %v865_v39  ;;  %v874_v54 = vmax.f32 %v872_v28, %v873_v40  ;;  %v882_v59 = vadd.f32 %v881_v43, %v880_v31  ;;  %v425_v27 = vld [vmem:[%s2541_s6] sm:$0x3] }
 0x392   :  { %v363_v35 = vmax.f32 %v361_v22, %v362_v29  ;;  %v371_v36 = vmax.f32 %v369_v23, %v370_v30  ;;  %v380_v37 = vrot.slane %v379_v33, 2  ;;  %v890_v0 = vadd.f32 %v889_v44, %v888_v32  ;;  %v409_v23 = vld [vmem:[%s2540_s5] sm:$0x3] }
 0x393   :  { %v388_v38 = vrot.slane %v387_v34, 2  ;;  %v867_v62 = vrot.slane %v866_v53, 1  ;;  %v875_v8 = vrot.slane %v874_v54, 1  ;;  %v883_v9 = vrot.slane %v882_v59, 1  ;;  %v907_v44 = vld [vmem:[%s2540_s5] sm:$0x3] }
 0x394   :  { %v364_v41 = vrot.slane %v363_v35, 2  ;;  %v372_v42 = vrot.slane %v371_v36, 2  ;;  %v381_v45 = vadd.f32 %v380_v37, %v379_v33  ;;  %v891_v7 = vrot.slane %v890_v0, 1 }
 0x395   :  { %v389_v46 = vadd.f32 %v388_v38, %v387_v34  ;;  %v1741_v13 = vmax.f32 %v866_v53, %v867_v62  ;;  %v1743_v4 = vmax.f32 %v874_v54, %v875_v8  ;;  %v884_v14 = vadd.f32 %v883_v9, %v882_v59 }
 0x396   :  { %v365_v47 = vmax.f32 %v363_v35, %v364_v41  ;;  %v373_v48 = vmax.f32 %v371_v36, %v372_v42  ;;  %v382_v49 = vrot.slane %v381_v45, 1  ;;  %v892_v15 = vadd.f32 %v891_v7, %v890_v0  ;;  %v1334_v0 = vld [vmem:[%s2540_s5 + $0x2] sm:$0x3] }
 0x397   :  { %v390_v50 = vrot.slane %v389_v46, 1  ;;  %v1747_v20 = vmul.f32 0.041666668, %v884_v14  ;;  %v398_v21 = vlaneseq }
 0x398   :  { %v366_v51 = vrot.slane %v365_v47, 1  ;;  %v374_v52 = vrot.slane %v373_v48, 1  ;;  %v383_v5 = vadd.f32 %v382_v49, %v381_v45  ;;  %v1749_v18 = vmul.f32 0.041666668, %v892_v15  ;;  %v923_v45 = vld [vmem:[%s2541_s6] sm:$0x3] }
 0x399   :  { %v391_v6 = vadd.f32 %v390_v50, %v389_v46  ;;  %v1809_v19 = vand.u32 127, %v398_v21  ;;  %v412_v22 = vshrl.u32 %v398_v21, 7 }
 0x39a   :  { %v1729_v1 = vmax.f32 %v365_v47, %v366_v51  ;;  %v1731_v17 = vmax.f32 %v373_v48, %v374_v52  ;;  %v1735_v12 = vmul.f32 0.041666668, %v383_v5 }
 0x39b   :  { %v1737_v2 = vmul.f32 0.041666668, %v391_v6  ;;  %vm400_vm6 = vcmp.lt.s32.totalorder %v1809_v19, 17  ;;  %v1819_v24 = vsub.s32 0, %v412_v22  ;;  %v1824_v28 = vsub.s32 1, %v412_v22 }
 0x39c   :  { %396 = vrot.lane.b32.xlu0 %v1731_v17, %s1504_s3  ;;  %394 = vrot.lane.b32.xlu1 %v1729_v1, %s1504_s3  ;;  %vm445_vm7 = vcmp.lt.s32.totalorder %v1809_v19, 16  ;;  %vm492_vm8 = vcmp.lt.s32.totalorder %v1809_v19, 15  ;;  %vm539_vm9 = vcmp.lt.s32.totalorder %v1809_v19, 1  ;;  %vm620_vm10 = vcmp.lt.s32.totalorder %v1809_v19, 127 }
 0x39d   :  { %v414_v30 = vrot.slane %v409_v23, %v1819_v24  ;;  %v418_v33 = vrot.slane %v409_v23, %v1824_v28  ;;  %v430_v34 = vrot.slane %v425_v27, %v1819_v24  ;;  %v434_v35 = vrot.slane %v425_v27, %v1824_v28  ;;  %v1350_v23 = vld [vmem:[%s2540_s5 + $0x2] sm:$0x3] }
 0x39e   :  { %v912_v50 = vrot.slane %v907_v44, %v1819_v24  ;;  %v916_v53 = vrot.slane %v907_v44, %v1824_v28  ;;  %v928_v54 = vrot.slane %v923_v45, %v1819_v24  ;;  %v932_v59 = vrot.slane %v923_v45, %v1824_v28 }
 0x39f   :  { %v460_v9 = vrot.slane %v1334_v0, %v1819_v24  ;;  %v464_v7 = vrot.slane %v1334_v0, %v1824_v28  ;;  %vm667_vm11 = vcmp.lt.s32.totalorder %v1809_v19, 113  ;;  %vm714_vm12 = vcmp.lt.s32.totalorder %v1809_v19, 112 }
 0x3a0   :  { %405 = vrot.lane.b32.xlu0 %v1737_v2, %s1504_s3  ;;  %403 = vrot.lane.b32.xlu1 %v1735_v12, %s1504_s3  ;;  %vm761_vm13 = vcmp.lt.s32.totalorder %v1809_v19, 111 }
 0x3a4   :  { %897 = vrot.lane.b32.xlu0 %v1743_v4, %s1504_s3  ;;  %895 = vrot.lane.b32.xlu1 %v1741_v13, %s1504_s3 }
 0x3a8   :  { %903 = vrot.lane.b32.xlu0 %v1749_v18, %s1504_s3  ;;  %901 = vrot.lane.b32.xlu1 %v1747_v20, %s1504_s3 }
 0x3ac   :  { %443 = vrot.lane.b32.xlu0 %v1731_v17, %s1497_s16  ;;  %441 = vrot.lane.b32.xlu1 %v1729_v1, %s1497_s16 }
 0x3b0   :  { %941 = vrot.lane.b32.xlu0 %v1743_v4, %s1497_s16  ;;  %939 = vrot.lane.b32.xlu1 %v1741_v13, %s1497_s16 }
 0x3b4   :  { %450 = vrot.lane.b32.xlu0 %v1737_v2, %s1497_s16  ;;  %448 = vrot.lane.b32.xlu1 %v1735_v12, %s1497_s16 }
 0x3b8   :  { %947 = vrot.lane.b32.xlu0 %v1749_v18, %s1497_s16  ;;  %945 = vrot.lane.b32.xlu1 %v1747_v20, %s1497_s16 }
 0x3bc   :  { %490 = vrot.lane.b32.xlu0 %v1731_v17, %s1505_s10  ;;  %488 = vrot.lane.b32.xlu1 %v1729_v1, %s1505_s10 }
 0x3c0   :  { %985 = vrot.lane.b32.xlu0 %v1743_v4, %s1505_s10  ;;  %983 = vrot.lane.b32.xlu1 %v1741_v13, %s1505_s10 }
 0x3c4   :  { %497 = vrot.lane.b32.xlu0 %v1737_v2, %s1505_s10  ;;  %495 = vrot.lane.b32.xlu1 %v1735_v12, %s1505_s10 }
 0x3c8   :  { %991 = vrot.lane.b32.xlu0 %v1749_v18, %s1505_s10  ;;  %989 = vrot.lane.b32.xlu1 %v1747_v20, %s1505_s10 }
 0x3cc   :  { %537 = vrot.lane.b32.xlu0 %v1731_v17, %s1506_s11  ;;  %535 = vrot.lane.b32.xlu1 %v1729_v1, %s1506_s11 }
 0x3d0   :  { %1029 = vrot.lane.b32.xlu0 %v1743_v4, %s1506_s11  ;;  %1027 = vrot.lane.b32.xlu1 %v1741_v13, %s1506_s11 }
 0x3d4   :  { %544 = vrot.lane.b32.xlu0 %v1737_v2, %s1506_s11  ;;  %542 = vrot.lane.b32.xlu1 %v1735_v12, %s1506_s11 }
 0x3d8   :  { %1035 = vrot.lane.b32.xlu0 %v1749_v18, %s1506_s11  ;;  %1033 = vrot.lane.b32.xlu1 %v1747_v20, %s1506_s11 }
 0x3dc   :  { %618 = vrot.lane.b32.xlu0 %v1731_v17, %s1507_s12  ;;  %616 = vrot.lane.b32.xlu1 %v1729_v1, %s1507_s12 }
 0x3e0   :  { %1105 = vrot.lane.b32.xlu0 %v1743_v4, %s1507_s12  ;;  %1103 = vrot.lane.b32.xlu1 %v1741_v13, %s1507_s12 }
 0x3e4   :  { %625 = vrot.lane.b32.xlu0 %v1737_v2, %s1507_s12  ;;  %623 = vrot.lane.b32.xlu1 %v1735_v12, %s1507_s12 }
 0x3e8   :  { %1111 = vrot.lane.b32.xlu0 %v1749_v18, %s1507_s12  ;;  %1109 = vrot.lane.b32.xlu1 %v1747_v20, %s1507_s12 }
 0x3ec   :  { %665 = vrot.lane.b32.xlu0 %v1731_v17, %s1508_s13  ;;  %663 = vrot.lane.b32.xlu1 %v1729_v1, %s1508_s13 }
 0x3f0   :  { %1149 = vrot.lane.b32.xlu0 %v1743_v4, %s1508_s13  ;;  %1147 = vrot.lane.b32.xlu1 %v1741_v13, %s1508_s13 }
 0x3f4   :  { %672 = vrot.lane.b32.xlu0 %v1737_v2, %s1508_s13  ;;  %670 = vrot.lane.b32.xlu1 %v1735_v12, %s1508_s13 }
 0x3f8   :  { %1155 = vrot.lane.b32.xlu0 %v1749_v18, %s1508_s13  ;;  %1153 = vrot.lane.b32.xlu1 %v1747_v20, %s1508_s13 }
 0x3fc   :  { %712 = vrot.lane.b32.xlu0 %v1731_v17, %s1509_s14  ;;  %710 = vrot.lane.b32.xlu1 %v1729_v1, %s1509_s14 }
 0x400   :  { %1193 = vrot.lane.b32.xlu0 %v1743_v4, %s1509_s14  ;;  %1191 = vrot.lane.b32.xlu1 %v1741_v13, %s1509_s14 }
 0x404   :  { %719 = vrot.lane.b32.xlu0 %v1737_v2, %s1509_s14  ;;  %717 = vrot.lane.b32.xlu1 %v1735_v12, %s1509_s14 }
 0x408   :  { %1199 = vrot.lane.b32.xlu0 %v1749_v18, %s1509_s14  ;;  %1197 = vrot.lane.b32.xlu1 %v1747_v20, %s1509_s14 }
 0x40c   :  { %759 = vrot.lane.b32.xlu0 %v1731_v17, %s1510_s17  ;;  %757 = vrot.lane.b32.xlu1 %v1729_v1, %s1510_s17 }
 0x40e   :  { %v397_v25 = vpop.permute.xlu0 %396  ;;  %v395_v29 = vpop.permute.xlu1 %394 }
 0x40f   :  { %v401_v31 = vsel %vm400_vm6, %v395_v29, %v397_v25  ;;  %v402_v32 = vsel %vm400_vm6, %v397_v25, %v395_v29 }
 0x410   :  { %1237 = vrot.lane.b32.xlu0 %v1743_v4, %s1510_s17  ;;  %1235 = vrot.lane.b32.xlu1 %v1741_v13, %s1510_s17  ;;  %v421_v38 = vmul.f32 %v414_v30, %v402_v32  ;;  %v422_v41 = vmul.f32 %v418_v33, %v401_v31 }
 0x412   :  { %v406_v36 = vpop.permute.xlu0 %405  ;;  %v404_v37 = vpop.permute.xlu1 %403 }
 0x413   :  { %v407_v39 = vsel %vm400_vm6, %v404_v37, %v406_v36  ;;  %v408_v40 = vsel %vm400_vm6, %v406_v36, %v404_v37  ;;  %v960_v36 = vrot.slane %v1350_v23, %v1824_v28  ;;  %v1335_v37 = vld [vmem:[%s2541_s6 + $0x2] sm:$0x3] }
 0x414   :  { %v437_v42 = vmul.f32 %v430_v34, %v408_v40  ;;  %v438_v43 = vmul.f32 %v434_v35, %v407_v39  ;;  %766 = vrot.lane.b32.xlu0 %v1737_v2, %s1510_s17  ;;  %764 = vrot.lane.b32.xlu1 %v1735_v12, %s1510_s17  ;;  %v956_v35 = vrot.slane %v1350_v23, %v1819_v24 }
 0x416   :  { %v439_v46 = vadd.f32 %v437_v42, %v421_v38  ;;  %v440_v47 = vadd.f32 %v438_v43, %v422_v41  ;;  %v898_v48 = vpop.permute.xlu0 %897  ;;  %v896_v49 = vpop.permute.xlu1 %895 }
 0x417   :  { %v899_v51 = vsel %vm400_vm6, %v896_v49, %v898_v48  ;;  %v900_v52 = vsel %vm400_vm6, %v898_v48, %v896_v49  ;;  %v477_v48 = vrot.slane %v1335_v37, %v1819_v24  ;;  %v481_v49 = vrot.slane %v1335_v37, %v1824_v28 }
 0x418   :  { %1243 = vrot.lane.b32.xlu0 %v1749_v18, %s1510_s17  ;;  %1241 = vrot.lane.b32.xlu1 %v1747_v20, %s1510_s17  ;;  %v919_v14 = vmul.f32 %v912_v50, %v900_v52  ;;  %v920_v15 = vmul.f32 %v916_v53, %v899_v51  ;;  %v1351_v50 = vld [vmem:[%s2541_s6 + $0x2] sm:$0x3] }
 0x41a   :  { %v904_v5 = vpop.permute.xlu0 %903  ;;  %v902_v6 = vpop.permute.xlu1 %901 }
 0x41b   :  { %v905_v62 = vsel %vm400_vm6, %v902_v6, %v904_v5  ;;  %v906_v8 = vsel %vm400_vm6, %v904_v5, %v902_v6  ;;  %v972_v5 = vrot.slane %v1351_v50, %v1819_v24  ;;  %v976_v6 = vrot.slane %v1351_v50, %v1824_v28  ;;  %v1341_v50 = vld [vmem:[%s2541_s6 + $0x8] sm:$0x3] }
 0x41c   :  { %v935_v21 = vmul.f32 %v928_v54, %v906_v8  ;;  %v936_v22 = vmul.f32 %v932_v59, %v905_v62 }
 0x41e   :  { %v937_v27 = vadd.f32 %v935_v21, %v919_v14  ;;  %v938_v25 = vadd.f32 %v936_v22, %v920_v15  ;;  %v444_v29 = vpop.permute.xlu0 %443  ;;  %v442_v30 = vpop.permute.xlu1 %441 }
 0x41f   :  { %v446_v31 = vsel %vm445_vm7, %v442_v30, %v444_v29  ;;  %v447_v32 = vsel %vm445_vm7, %v444_v29, %v442_v30 }
 0x420   :  { %v467_v33 = vmul.f32 %v460_v9, %v447_v32  ;;  %v468_v34 = vmul.f32 %v464_v7, %v446_v31 }
 0x422   :  { %v469_v38 = vadd.f32 %v467_v33, %v439_v46  ;;  %v470_v39 = vadd.f32 %v468_v34, %v440_v47  ;;  %v942_v40 = vpop.permute.xlu0 %941  ;;  %v940_v41 = vpop.permute.xlu1 %939 }
 0x423   :  { %v943_v42 = vsel %vm445_vm7, %v940_v41, %v942_v40  ;;  %v944_v43 = vsel %vm445_vm7, %v942_v40, %v940_v41 }
 0x424   :  { %v963_v44 = vmul.f32 %v956_v35, %v944_v43  ;;  %v964_v45 = vmul.f32 %v960_v36, %v943_v42 }
 0x426   :  { %v965_v46 = vadd.f32 %v963_v44, %v937_v27  ;;  %v966_v47 = vadd.f32 %v964_v45, %v938_v25  ;;  %v451_v51 = vpop.permute.xlu0 %450  ;;  %v449_v52 = vpop.permute.xlu1 %448 }
 0x427   :  { %v452_v53 = vsel %vm445_vm7, %v449_v52, %v451_v51  ;;  %v453_v54 = vsel %vm445_vm7, %v451_v51, %v449_v52 }
 0x428   :  { %v484_v59 = vmul.f32 %v477_v48, %v453_v54  ;;  %v485_v0 = vmul.f32 %v481_v49, %v452_v53  ;;  %v1340_v48 = vld [vmem:[%s2540_s5 + $0x8] sm:$0x3] }
 0x429   :  { %v1356_v49 = vld [vmem:[%s2540_s5 + $0x8] sm:$0x3]  ;;  %v588_v52 = vrot.slane %v1340_v48, %v1819_v24  ;;  %v592_v53 = vrot.slane %v1340_v48, %v1824_v28 }
 0x42a   :  { %v1901_v62 = vadd.f32 %v484_v59, %v469_v38  ;;  %v1903_v8 = vadd.f32 %v485_v0, %v470_v39  ;;  %v948_v9 = vpop.permute.xlu0 %947  ;;  %v946_v7 = vpop.permute.xlu1 %945  ;;  %v1076_v54 = vrot.slane %v1356_v49, %v1819_v24  ;;  %v1080_v59 = vrot.slane %v1356_v49, %v1824_v28 }
 0x42b   :  { %v949_v14 = vsel %vm445_vm7, %v946_v7, %v948_v9  ;;  %v950_v15 = vsel %vm445_vm7, %v948_v9, %v946_v7  ;;  %v605_v0 = vrot.slane %v1341_v50, %v1819_v24  ;;  %v1336_v7 = vld [vmem:[%s2540_s5 + $0x4] sm:$0x3]  ;;  %v1989_v48 = vmul.f32 %v592_v53, %v1731_v17 }
 0x42c   :  { %v979_v21 = vmul.f32 %v972_v5, %v950_v15  ;;  %v980_v22 = vmul.f32 %v976_v6, %v949_v14  ;;  %v609_v5 = vrot.slane %v1341_v50, %v1824_v28  ;;  %v1992_v49 = vmul.f32 %v588_v52, %v1729_v1  ;;  %v1997_v50 = vld [vmem:[%s2541_s6 + $0x4] sm:$0x3]  ;;  %v2016_v52 = vld [vmem:[%s2540_s5 + $0x6] sm:$0x3] }
 0x42d   :  { %v2003_v58 = vmul.f32 %v1080_v59, %v1743_v4  ;;  %v2006_v60 = vmul.f32 %v605_v0, %v1735_v12  ;;  %v507_v1 = vrot.slane %v1336_v7, %v1819_v24  ;;  %v511_v4 = vrot.slane %v1336_v7, %v1824_v28  ;;  %v2037_v0 = vld [vmem:[%s2541_s6 + $0x6] sm:$0x3] }
 0x42e   :  { %v1909_v23 = vadd.f32 %v979_v21, %v965_v46  ;;  %v1911_v27 = vadd.f32 %v980_v22, %v966_v47  ;;  %v1913_v25 = vpop.permute.xlu0 %490  ;;  %v1915_v29 = vpop.permute.xlu1 %488  ;;  %v1357_v47 = vld [vmem:[%s2541_s6 + $0x8] sm:$0x3]  ;;  %v1352_v21 = vld [vmem:[%s2540_s5 + $0x4] sm:$0x3]  ;;  %v2009_v17 = vmul.f32 %v609_v5, %v1737_v2  ;;  %v2053_v7 = vld [vmem:[%s2541_s6 + $0x6] sm:$0x3]  ;;  %v558_v56 = vrot.slane %v2016_v52, %v1824_v28 }
 0x42f   :  { %v1092_v6 = vrot.slane %v1357_v47, %v1819_v24  ;;  %v1096_v9 = vrot.slane %v1357_v47, %v1824_v28  ;;  %v1986_v22 = vld [vmem:[%s2541_s6 + $0x4] sm:$0x3]  ;;  %v2000_v47 = vmul.f32 %v1076_v54, %v1741_v13  ;;  %v2021_v13 = vld [vmem:[%s2540_s5 + $0x6] sm:$0x3]  ;;  %v1000_v53 = vrot.slane %v1352_v21, %v1819_v24 }
 0x430   :  { %v1004_v54 = vrot.slane %v1352_v21, %v1824_v28  ;;  %v524_v59 = vrot.slane %v1986_v22, %v1819_v24  ;;  %v2058_v21 = vld [vmem:[%s2540_s5 + $0xa] sm:$0x3]  ;;  %v1048_v57 = vrot.slane %v2021_v13, %v1824_v28  ;;  %v493_v55 = vsel %vm492_vm8, %v1915_v29, %v1913_v25 }
 0x431   :  { %v2024_v12 = vmul.f32 %v1092_v6, %v1747_v20  ;;  %v2027_v2 = vmul.f32 %v1096_v9, %v1749_v18  ;;  %v528_v18 = vrot.slane %v1986_v22, %v1824_v28  ;;  %v1016_v6 = vrot.slane %v1997_v50, %v1819_v24 }
 0x432   :  { %v1917_v30 = vpop.permute.xlu0 %985  ;;  %v1919_v31 = vpop.permute.xlu1 %983  ;;  %v1020_v9 = vrot.slane %v1997_v50, %v1824_v28  ;;  %v554_v22 = vrot.slane %v2016_v52, %v1819_v24  ;;  %v1044_v50 = vrot.slane %v2021_v13, %v1819_v24  ;;  %v494_v52 = vsel %vm492_vm8, %v1913_v25, %v1915_v29  ;;  %v2096_v25 = vld [vmem:[%s2541_s6 + $0xa] sm:$0x3] }
 0x433   :  { %2572 = vst [vmem:[#allocation21_spill] sm:$0xff] %v2024_v12  ;;  %2573 = vst [vmem:[#allocation22_spill] sm:$0xff] %v2027_v2  ;;  %v571_v11 = vrot.slane %v2037_v0, %v1819_v24  ;;  %v575_v13 = vrot.slane %v2037_v0, %v1824_v28  ;;  %v1060_v16 = vrot.slane %v2053_v7, %v1819_v24  ;;  %v2117_v2 = vld [vmem:[%s2541_s6 + $0xa] sm:$0x3] }
 0x434   :  { %v1064_v3 = vrot.slane %v2053_v7, %v1824_v28  ;;  %v987_v7 = vsel %vm492_vm8, %v1919_v31, %v1917_v30  ;;  %v988_v10 = vsel %vm492_vm8, %v1917_v30, %v1919_v31  ;;  %v514_v12 = vmul.f32 %v507_v1, %v494_v52 }
 0x435   :  { %v652_v1 = vrot.slane %v2096_v25, %v1819_v24  ;;  %v1007_v52 = vmul.f32 %v1000_v53, %v988_v10  ;;  %v1008_v63 = vmul.f32 %v1004_v54, %v987_v7 }
 0x436   :  { %v1921_v32 = vpop.permute.xlu0 %497  ;;  %v1923_v33 = vpop.permute.xlu1 %495  ;;  %v516_v53 = vadd.f32 %v514_v12, %v1901_v62 }
 0x437   :  { %v500_v30 = vsel %vm492_vm8, %v1921_v32, %v1923_v33 }
 0x43a   :  { %v1925_v34 = vpop.permute.xlu0 %991  ;;  %v1927_v35 = vpop.permute.xlu1 %989 }
 0x43b   :  { %v993_v31 = vsel %vm492_vm8, %v1927_v35, %v1925_v34 }
 0x43e   :  { %v1929_v36 = vpop.permute.xlu0 %537  ;;  %v1931_v37 = vpop.permute.xlu1 %535 }
 0x43f   :  { %v541_v10 = vsel %vm539_vm9, %v1929_v36, %v1931_v37 }
 0x440   :  { %v561_v12 = vmul.f32 %v554_v22, %v541_v10  ;;  %v2196_v22 = vld [vmem:[%s2540_s5 + $0xc] sm:$0x3] }
 0x442   :  { %v1933_v38 = vpop.permute.xlu0 %1029  ;;  %v1935_v39 = vpop.permute.xlu1 %1027 }
 0x446   :  { %v1937_v40 = vpop.permute.xlu0 %544  ;;  %v1939_v41 = vpop.permute.xlu1 %542 }
 0x447   :  { %v547_v62 = vsel %vm539_vm9, %v1937_v40, %v1939_v41 }
 0x44a   :  { %v1941_v42 = vpop.permute.xlu0 %1035  ;;  %v1943_v43 = vpop.permute.xlu1 %1033 }
 0x44e   :  { %v1945_v44 = vpop.permute.xlu0 %618  ;;  %v1947_v45 = vpop.permute.xlu1 %616 }
 0x452   :  { %v1958_v46 = vpop.permute.xlu0 %1105  ;;  %v1963_v51 = vpop.permute.xlu1 %1103 }
 0x456   :  { %v1976_v14 = vpop.permute.xlu0 %625  ;;  %v1978_v15 = vpop.permute.xlu1 %623 }
 0x45a   :  { %v2039_v5 = vpop.permute.xlu0 %1111  ;;  %v2041_v20 = vpop.permute.xlu1 %1109 }
 0x45b   :  { %2574 = vst [vmem:[#allocation23_spill] sm:$0xff] %v2039_v5  ;;  %2575 = vst [vmem:[#allocation24_spill] sm:$0xff] %v2041_v20  ;;  %v531_v5 = vmul.f32 %v524_v59, %v500_v30  ;;  %v1031_v59 = vsel %vm539_vm9, %v1935_v39, %v1933_v38 }
 0x45e   :  { %v2098_v29 = vpop.permute.xlu0 %665  ;;  %v2100_v0 = vpop.permute.xlu1 %663 }
 0x45f   :  { %2576 = vst [vmem:[#allocation25_spill] sm:$0xff] %v2098_v29  ;;  %2577 = vst [vmem:[#allocation26_spill] sm:$0xff] %v2100_v0  ;;  %v515_v0 = vmul.f32 %v511_v4, %v493_v55  ;;  %v499_v29 = vsel %vm492_vm8, %v1923_v33, %v1921_v32  ;;  %v994_v55 = vsel %vm492_vm8, %v1925_v34, %v1927_v35 }
 0x460   :  { %v656_v4 = vrot.slane %v2096_v25, %v1824_v28  ;;  %v1136_v32 = vrot.slane %v2117_v2, %v1819_v24  ;;  %v532_v34 = vmul.f32 %v528_v18, %v499_v29  ;;  %v540_v35 = vsel %vm539_vm9, %v1931_v37, %v1929_v36  ;;  %v2587_v25 = vld [vmem:[#allocation22_spill] sm:$0xff] }
 0x461   :  { %v517_v54 = vadd.f32 %v515_v0, %v1903_v8  ;;  %v1023_v7 = vmul.f32 %v1016_v6, %v994_v55  ;;  %v1024_v33 = vmul.f32 %v1020_v9, %v993_v31  ;;  %v1032_v18 = vsel %vm539_vm9, %v1933_v38, %v1935_v39  ;;  %v2179_v38 = vld [vmem:[%s2540_s5 + $0xc] sm:$0x3] }
 0x462   :  { %v2143_v61 = vpop.permute.xlu0 %1149  ;;  %v2145_v20 = vpop.permute.xlu1 %1147  ;;  %v546_v36 = vsel %vm539_vm9, %v1939_v41, %v1937_v40  ;;  %v1009_v8 = vadd.f32 %v1007_v52, %v1909_v23  ;;  %v1010_v37 = vadd.f32 %v1008_v63, %v1911_v27  ;;  %v562_v6 = vmul.f32 %v558_v56, %v540_v35  ;;  %v2212_v52 = vld [vmem:[%s2541_s6 + $0xc] sm:$0x3] }
 0x463   :  { %v533_v29 = vadd.f32 %v531_v5, %v516_v53  ;;  %v534_v0 = vadd.f32 %v532_v34, %v517_v54  ;;  %v1037_v23 = vsel %vm539_vm9, %v1943_v43, %v1941_v42  ;;  %v1038_v56 = vsel %vm539_vm9, %v1941_v42, %v1943_v43  ;;  %v2201_v5 = vld [vmem:[%s2541_s6 + $0xc] sm:$0x3]  ;;  %v2233_v53 = vld [vmem:[%s2540_s5 + $0xe] sm:$0x3] }
 0x464   :  { %v1051_v63 = vmul.f32 %v1044_v50, %v1032_v18  ;;  %v1052_v27 = vmul.f32 %v1048_v57, %v1031_v59  ;;  %v578_v40 = vmul.f32 %v571_v11, %v547_v62  ;;  %v579_v41 = vmul.f32 %v575_v13, %v546_v36  ;;  %v2238_v36 = vld [vmem:[%s2541_s6 + $0xe] sm:$0x3] }
 0x465   :  { %v1025_v30 = vadd.f32 %v1023_v7, %v1009_v8  ;;  %v1026_v31 = vadd.f32 %v1024_v33, %v1010_v37  ;;  %v682_v55 = vrot.slane %v2179_v38, %v1819_v24  ;;  %v686_v57 = vrot.slane %v2179_v38, %v1824_v28  ;;  %v2219_v33 = vld [vmem:[%s2540_s5 + $0xe] sm:$0x3] }
 0x466   :  { %v2181_v39 = vpop.permute.xlu0 %672  ;;  %v2183_v9 = vpop.permute.xlu1 %670  ;;  %v563_v11 = vadd.f32 %v561_v12, %v533_v29  ;;  %v564_v42 = vadd.f32 %v562_v6, %v534_v0  ;;  %v1067_v43 = vmul.f32 %v1060_v16, %v1038_v56  ;;  %v1068_v50 = vmul.f32 %v1064_v3, %v1037_v23  ;;  %v2243_v62 = vld [vmem:[%s2541_s6 + $0xe] sm:$0x3] }
 0x467   :  { %v1164_v16 = vrot.slane %v2196_v22, %v1819_v24  ;;  %v1168_v3 = vrot.slane %v2196_v22, %v1824_v28  ;;  %v699_v35 = vrot.slane %v2201_v5, %v1819_v24  ;;  %v703_v10 = vrot.slane %v2201_v5, %v1824_v28 }
 0x468   :  { %v1053_v54 = vadd.f32 %v1051_v63, %v1025_v30  ;;  %v1054_v7 = vadd.f32 %v1052_v27, %v1026_v31  ;;  %v580_v59 = vadd.f32 %v578_v40, %v563_v11  ;;  %v581_v18 = vadd.f32 %v579_v41, %v564_v42  ;;  %v2264_v40 = vld [vmem:[%s2540_s5 + $0x10] sm:$0x3] }
 0x469   :  { %v1180_v8 = vrot.slane %v2212_v52, %v1819_v24  ;;  %v1184_v37 = vrot.slane %v2212_v52, %v1824_v28  ;;  %v729_v12 = vrot.slane %v2219_v33, %v1819_v24  ;;  %v733_v6 = vrot.slane %v2219_v33, %v1824_v28  ;;  %v2269_v41 = vld [vmem:[%s2540_s5 + $0x10] sm:$0x3] }
 0x46a   :  { %v2207_v13 = vpop.permute.xlu0 %1155  ;;  %v2214_v34 = vpop.permute.xlu1 %1153  ;;  %v1069_v29 = vadd.f32 %v1067_v43, %v1053_v54  ;;  %v1070_v0 = vadd.f32 %v1068_v50, %v1054_v7  ;;  %v1208_v63 = vrot.slane %v2233_v53, %v1819_v24  ;;  %v597_v43 = vadd.f32 %v1992_v49, %v580_v59  ;;  %v2582_v27 = vld [vmem:[#allocation23_spill] sm:$0xff] }
 0x46b   :  { %v598_v50 = vadd.f32 %v1989_v48, %v581_v18  ;;  %v621_v54 = vsel %vm620_vm10, %v1947_v45, %v1945_v44  ;;  %v622_v7 = vsel %vm620_vm10, %v1945_v44, %v1947_v45  ;;  %v2301_v18 = vld [vmem:[%s2541_s6 + $0x10] sm:$0x3]  ;;  %v1107_v42 = vsel %vm620_vm10, %v1963_v51, %v1958_v46 }
 0x46c   :  { %v1085_v44 = vadd.f32 %v2000_v47, %v1069_v29  ;;  %v1086_v45 = vadd.f32 %v2003_v58, %v1070_v0  ;;  %v1108_v48 = vsel %vm620_vm10, %v1958_v46, %v1963_v51  ;;  %v2578_v11 = vrot.slane %v2058_v21, %v1819_v24 }
 0x46d   :  { %v2579_v47 = vrot.slane %v2058_v21, %v1824_v28  ;;  %v627_v29 = vsel %vm620_vm10, %v1978_v15, %v1976_v14  ;;  %v628_v46 = vsel %vm620_vm10, %v1976_v14, %v1978_v15  ;;  %v615_v51 = vadd.f32 %v2009_v17, %v598_v50  ;;  %v2583_v14 = vld [vmem:[#allocation24_spill] sm:$0xff] }
 0x46e   :  { %v2253_v23 = vpop.permute.xlu0 %712  ;;  %v2255_v56 = vpop.permute.xlu1 %710  ;;  %v642_v31 = vmul.f32 %v2578_v11, %v621_v54  ;;  %v614_v0 = vadd.f32 %v2006_v60, %v597_v43  ;;  %v2580_v54 = vrot.slane %v2071_v26, %v1819_v24  ;;  %v1113_v15 = vsel %vm620_vm10, %v2583_v14, %v2582_v27  ;;  %v2585_v43 = vld [vmem:[#allocation26_spill] sm:$0xff] }
 0x46f   :  { %v643_v58 = vmul.f32 %v2579_v47, %v622_v7  ;;  %v2581_v47 = vrot.slane %v2071_v26, %v1824_v28  ;;  %v1114_v60 = vsel %vm620_vm10, %v2582_v27, %v2583_v14  ;;  %v659_v17 = vmul.f32 %v652_v1, %v627_v29  ;;  %v2584_v26 = vld [vmem:[#allocation25_spill] sm:$0xff] }
 0x470   :  { %v1127_v7 = vmul.f32 %v2580_v54, %v1107_v42  ;;  %v660_v42 = vmul.f32 %v656_v4, %v628_v46  ;;  %v668_v50 = vsel %vm667_vm11, %v2585_v43, %v2584_v26  ;;  %v2586_v29 = vld [vmem:[#allocation21_spill] sm:$0xff]  ;;  %v1102_v4 = vadd.f32 %v2587_v25, %v1086_v45 }
 0x471   :  { %v1128_v30 = vmul.f32 %v2581_v47, %v1108_v48  ;;  %v669_v48 = vsel %vm667_vm11, %v2584_v26, %v2585_v43  ;;  %v644_v47 = vadd.f32 %v642_v31, %v614_v0  ;;  %v645_v1 = vadd.f32 %v643_v58, %v615_v51 }
 0x472   :  { %v1194_v59 = vpop.permute.xlu0 %1193  ;;  %v1192_v49 = vpop.permute.xlu1 %1191  ;;  %v1101_v14 = vadd.f32 %v2586_v29, %v1085_v44  ;;  %v1143_v46 = vmul.f32 %v1136_v32, %v1113_v15  ;;  %v2588_v21 = vrot.slane %v2117_v2, %v1824_v28  ;;  %v1151_v26 = vsel %vm667_vm11, %v2145_v20, %v2143_v61  ;;  %v1365_v29 = vld [vmem:[%s2541_s6 + $0x10] sm:$0x3] }
 0x473   :  { %v1152_v31 = vsel %vm667_vm11, %v2143_v61, %v2145_v20  ;;  %v689_v44 = vmul.f32 %v682_v55, %v668_v50  ;;  %v690_v32 = vmul.f32 %v686_v57, %v669_v48  ;;  %v674_v2 = vsel %vm667_vm11, %v2183_v9, %v2181_v39 }
 0x474   :  { %v1144_v11 = vmul.f32 %v2588_v21, %v1114_v60  ;;  %v675_v45 = vsel %vm667_vm11, %v2181_v39, %v2183_v9  ;;  %v1129_v58 = vadd.f32 %v1127_v7, %v1101_v14  ;;  %v1130_v61 = vadd.f32 %v1128_v30, %v1102_v4 }
 0x475   :  { %v661_v20 = vadd.f32 %v659_v17, %v644_v47  ;;  %v662_v51 = vadd.f32 %v660_v42, %v645_v1  ;;  %v1171_v38 = vmul.f32 %v1164_v16, %v1151_v26  ;;  %v1172_v57 = vmul.f32 %v1168_v3, %v1152_v31 }
 0x476   :  { %v720_v54 = vpop.permute.xlu0 %719  ;;  %v718_v27 = vpop.permute.xlu1 %717  ;;  %v1157_v21 = vsel %vm667_vm11, %v2214_v34, %v2207_v13  ;;  %v1158_v39 = vsel %vm667_vm11, %v2207_v13, %v2214_v34  ;;  %v706_v9 = vmul.f32 %v699_v35, %v674_v2  ;;  %v707_v16 = vmul.f32 %v703_v10, %v675_v45 }
 0x477   :  { %v715_v22 = vsel %vm714_vm12, %v2255_v56, %v2253_v23  ;;  %v716_v3 = vsel %vm714_vm12, %v2253_v23, %v2255_v56  ;;  %v1145_v30 = vadd.f32 %v1143_v46, %v1129_v58  ;;  %v1146_v13 = vadd.f32 %v1144_v11, %v1130_v61 }
 0x478   :  { %v691_v34 = vadd.f32 %v689_v44, %v661_v20  ;;  %v692_v7 = vadd.f32 %v690_v32, %v662_v51  ;;  %v1187_v35 = vmul.f32 %v1180_v8, %v1157_v21  ;;  %v1188_v5 = vmul.f32 %v1184_v37, %v1158_v39 }
 0x479   :  { %v1195_v10 = vsel %vm714_vm12, %v1192_v49, %v1194_v59  ;;  %v1196_v15 = vsel %vm714_vm12, %v1194_v59, %v1192_v49  ;;  %v736_v56 = vmul.f32 %v729_v12, %v715_v22  ;;  %v737_v8 = vmul.f32 %v733_v6, %v716_v3 }
 0x47a   :  { %v1200_v0 = vpop.permute.xlu0 %1199  ;;  %v1198_v55 = vpop.permute.xlu1 %1197  ;;  %v721_v52 = vsel %vm714_vm12, %v718_v27, %v720_v54  ;;  %v722_v37 = vsel %vm714_vm12, %v720_v54, %v718_v27  ;;  %v1173_v11 = vadd.f32 %v1171_v38, %v1145_v30  ;;  %v1174_v17 = vadd.f32 %v1172_v57, %v1146_v13 }
 0x47b   :  { %v708_v42 = vadd.f32 %v706_v9, %v691_v34  ;;  %v709_v49 = vadd.f32 %v707_v16, %v692_v7  ;;  %v1215_v59 = vmul.f32 %v1208_v63, %v1195_v10  ;;  %v2589_v12 = vrot.slane %v2233_v53, %v1824_v28 }
 0x47c   :  { %v2590_v50 = vrot.slane %v2238_v36, %v1819_v24  ;;  %v2591_v54 = vrot.slane %v2238_v36, %v1824_v28  ;;  %v1201_v63 = vsel %vm714_vm12, %v1198_v55, %v1200_v0  ;;  %v1202_v53 = vsel %vm714_vm12, %v1200_v0, %v1198_v55 }
 0x47d   :  { %v1216_v43 = vmul.f32 %v2589_v12, %v1196_v15  ;;  %v1189_v14 = vadd.f32 %v1187_v35, %v1173_v11  ;;  %v1190_v25 = vadd.f32 %v1188_v5, %v1174_v17  ;;  %v738_v4 = vadd.f32 %v736_v56, %v708_v42 }
 0x47e   :  { %v760_v60 = vpop.permute.xlu0 %759  ;;  %v758_v23 = vpop.permute.xlu1 %757  ;;  %v753_v48 = vmul.f32 %v2590_v50, %v721_v52  ;;  %v754_v27 = vmul.f32 %v2591_v54, %v722_v37  ;;  %v739_v46 = vadd.f32 %v737_v8, %v709_v49  ;;  %v2592_v36 = vrot.slane %v2264_v40, %v1819_v24 }
 0x47f   :  { %v762_v33 = vsel %vm761_vm13, %v758_v23, %v760_v60  ;;  %v763_v6 = vsel %vm761_vm13, %v760_v60, %v758_v23  ;;  %v2593_v31 = vrot.slane %v2264_v40, %v1824_v28  ;;  %v2594_v45 = vrot.slane %v2243_v62, %v1819_v24 }
 0x480   :  { %v783_v26 = vmul.f32 %v2592_v36, %v762_v33  ;;  %v2595_v61 = vrot.slane %v2243_v62, %v1824_v28  ;;  %v1268_v51 = vrot.slane %v1365_v29, %v1819_v24  ;;  %v1272_v0 = vrot.slane %v1365_v29, %v1824_v28 }
 0x481   :  { %v784_v44 = vmul.f32 %v2593_v31, %v763_v6  ;;  %v1231_v58 = vmul.f32 %v2594_v45, %v1201_v63  ;;  %v1217_v40 = vadd.f32 %v1215_v59, %v1189_v14  ;;  %v1218_v55 = vadd.f32 %v1216_v43, %v1190_v25  ;;  %v2600_v45 = vld [vmem:[#allocation17_spill] sm:$0xff] }
 0x482   :  { %v1238_v47 = vpop.permute.xlu0 %1237  ;;  %v1236_v1 = vpop.permute.xlu1 %1235  ;;  %v1232_v20 = vmul.f32 %v2595_v61, %v1202_v53  ;;  %v755_v38 = vadd.f32 %v753_v48, %v738_v4  ;;  %v756_v57 = vadd.f32 %v754_v27, %v739_v46  ;;  %v2596_v9 = vrot.slane %v2269_v41, %v1819_v24  ;;  %v2601_v61 = vld [vmem:[#allocation15_spill] sm:$0xff] }
 0x483   :  { %v1239_v32 = vsel %vm761_vm13, %v1236_v1, %v1238_v47  ;;  %v1240_v2 = vsel %vm761_vm13, %v1238_v47, %v1236_v1  ;;  %v2597_v22 = vrot.slane %v2269_v41, %v1824_v28  ;;  %v2598_v7 = vrot.slane %v2301_v18, %v1819_v24 }
 0x484   :  { %v1259_v16 = vmul.f32 %v2596_v9, %v1239_v32  ;;  %v785_v13 = vadd.f32 %v783_v26, %v755_v38  ;;  %v786_v34 = vadd.f32 %v784_v44, %v756_v57  ;;  %v2599_v5 = vrot.slane %v2301_v18, %v1824_v28  ;;  %v2604_v57 = vld [vmem:[#allocation16_spill] sm:$0xff] }
 0x485   :  { %v1260_v3 = vmul.f32 %v2597_v22, %v1240_v2  ;;  %v1233_v15 = vadd.f32 %v1231_v58, %v1217_v40  ;;  %v1234_v60 = vadd.f32 %v1232_v20, %v1218_v55  ;;  %v804_v41 = vstv %s2542_s7  ;;  %v2603_v55 = vld [vmem:[#allocation18_spill] sm:$0xff]  ;;  %s1511_s7 = smov [#allocation6]  }
 0x486   :  { %v767_v21 = vpop.permute.xlu0 %766  ;;  %v765_v39 = vpop.permute.xlu1 %764  ;;  %s1317_s13 = sshll.u32 %s1511_s7, 4  ;;  %s1318_s13 = int_to_ptr.vmem [resolvable:$true] %s1317_s13 }
 0x487   :  { %v768_v62 = vsel %vm761_vm13, %v765_v39, %v767_v21  ;;  %v769_v30 = vsel %vm761_vm13, %v767_v21, %v765_v39  ;;  %v1261_v37 = vadd.f32 %v1259_v16, %v1233_v15  ;;  %v1262_v11 = vadd.f32 %v1260_v3, %v1234_v60  ;;  %v2605_v39 = vld [vmem:[#allocation20_spill] sm:$0xff]  ;;  %v2610_v15 = vld [vmem:[#allocation14_spill] sm:$0xff]  ;;  %s1469_s14 = scalar_lea.vmem %s1318_s13, 1536  ;;  %p1474_p9 = scmp.lt.s32.totalorder %s1318_s13, %s1318_s13 }
 0x488   :  { %v800_v35 = vmul.f32 %v2598_v7, %v768_v62  ;;  %v801_v10 = vmul.f32 %v2599_v5, %v769_v30  ;;  %v2606_v62 = vld [vmem:[#allocation9_spill] sm:$0xff]  ;;  %v2608_v7 = vld [vmem:[#allocation11_spill] sm:$0xff]  ;;  %v2609_v5 = vld [vmem:[#allocation10_spill] sm:$0xff]  ;;  %p1470_p8 = scmp.ne.s32.totalorder %s1318_s13, %s1469_s14  ;;  %p1475_p10 = scmp.lt.s32.totalorder %s1469_s14, %s1469_s14 }
 0x48a   :  { %v802_v23 = vadd.f32 %v800_v35, %v785_v13  ;;  %v803_v56 = vadd.f32 %v801_v10, %v786_v34  ;;  %v1244_v8 = vpop.permute.xlu0 %1243  ;;  %v1242_v52 = vpop.permute.xlu1 %1241  ;;  %v2607_v13 = vld [vmem:[#allocation13_spill] sm:$0xff]  ;;  %p1476_p11 = por %p1475_p10, %p1474_p9 }
 0x48b   :  { %v1245_v17 = vsel %vm761_vm13, %v1242_v52, %v1244_v8  ;;  %v1246_v42 = vsel %vm761_vm13, %v1244_v8, %v1242_v52 }
 0x48c   :  { %v805_v28 = vadd.f32 %v804_v41, %v802_v23  ;;  %v806_v18 = vadd.f32 %v804_v41, %v803_v56  ;;  %v1275_v49 = vmul.f32 %v1268_v51, %v1245_v17  ;;  %v1276_v59 = vmul.f32 %v1272_v0, %v1246_v42  ;;  %v2602_v51 = vld [vmem:[#allocation19_spill] sm:$0xff]  ;;  %p1477_p12 = pnand %p1476_p11, %p1470_p8 }
 0x48e   :  { %v807_v12 = vsub.f32 0.0, %v805_v28  ;;  %v808_v43 = vsub.f32 0.0, %v806_v18  ;;  %v1277_v33 = vadd.f32 %v1275_v49, %v1261_v37  ;;  %v1278_v6 = vadd.f32 %v1276_v59, %v1262_v11 }
 0x490   :  { %v809_v50 = vmul.f32 1.442695, %v807_v12  ;;  %v811_v48 = vmul.f32 1.442695, %v808_v43  ;;  %v1279_v54 = vadd.f32 %v1277_v33, %v804_v41  ;;  %v1280_v27 = vadd.f32 %v1278_v6, %v804_v41  ;;  %v2611_v41 = vld [vmem:[#allocation12_spill] sm:$0xff] }
 0x492   :  { %1431 = vpow2.f32 %v809_v50  ;;  %v1281_v63 = vsub.f32 0.0, %v1279_v54  ;;  %v1282_v53 = vsub.f32 0.0, %v1280_v27 }
 0x493   :  { %1433 = vpow2.f32 %v811_v48 }
 0x494   :  { %v1283_v47 = vmul.f32 1.442695, %v1281_v63  ;;  %v1285_v1 = vmul.f32 1.442695, %v1282_v53 }
 0x496   :  { %1435 = vpow2.f32 %v1283_v47 }
 0x497   :  { %1437 = vpow2.f32 %v1285_v1 }
 0x49c   :  { %v1432_v19 = vpop.eup %1431 }
 0x49d   :  { %v1434_v29 = vpop.eup %1433  ;;  %v813_v14 = vadd.f32 1.0, %v1432_v19 }
 0x49e   :  { %v814_v25 = vadd.f32 1.0, %v1434_v29 }
 0x49f   :  { %1439 = vrcp.f32 %v813_v14 }
 0x4a0   :  { %v1436_v4 = vpop.eup %1435  ;;  %1441 = vrcp.f32 %v814_v25 }
 0x4a1   :  { %v1438_v46 = vpop.eup %1437  ;;  %v1287_v36 = vadd.f32 1.0, %v1436_v4 }
 0x4a2   :  { %v1288_v26 = vadd.f32 1.0, %v1438_v46 }
 0x4a3   :  { %1443 = vrcp.f32 %v1287_v36 }
 0x4a4   :  { %1445 = vrcp.f32 %v1288_v26 }
 0x4a9   :  { %v1440_v31 = vpop.eup %1439 }
 0x4aa   :  { %v1442_v44 = vpop.eup %1441  ;;  %v820_v32 = vrot.slane %v1440_v31, %v1819_v24 }
 0x4ab   :  { %v824_v2 = vrot.slane %v1442_v44, %v1819_v24 }
 0x4ac   :  { %v825_v58 = vmul.f32 %v820_v32, %v2600_v45  ;;  %v827_v20 = vmul.f32 %v820_v32, %v2601_v61  ;;  %v829_v0 = vmul.f32 %v820_v32, %v2602_v51 }
 0x4ad   :  { %v1444_v40 = vpop.eup %1443  ;;  %v826_v38 = vmul.f32 %v824_v2, %v2603_v55  ;;  %v828_v21 = vmul.f32 %v824_v2, %v2604_v57  ;;  %v830_v9 = vmul.f32 %v824_v2, %v2605_v39 }
 0x4ae   :  { %v1446_v16 = vpop.eup %1445  ;;  %831 = vst [vmem:[#allocation6] sm:$0xff] %v825_v58  ;;  %833 = vst [vmem:[#allocation6 + $0x10] sm:$0xff] %v827_v20  ;;  %v1294_v22 = vrot.slane %v1444_v40, %v1819_v24 }
 0x4af   :  { %835 = vst [vmem:[#allocation6 + $0x20] sm:$0xff] %v829_v0  ;;  %832 = vst [vmem:[#allocation6 + $0x8] sm:$0xff] %v826_v38  ;;  %v1298_v3 = vrot.slane %v1446_v16, %v1819_v24 }
 0x4b0   :  { %834 = vst [vmem:[#allocation6 + $0x18] sm:$0xff] %v828_v21  ;;  %836 = vst [vmem:[#allocation6 + $0x28] sm:$0xff] %v830_v9  ;;  %v1299_v30 = vmul.f32 %v1294_v22, %v2606_v62  ;;  %v1301_v34 = vmul.f32 %v1294_v22, %v2607_v13  ;;  %v1303_v35 = vmul.f32 %v1294_v22, %v2608_v7 }
 0x4b1   :  { %v1300_v10 = vmul.f32 %v1298_v3, %v2609_v5  ;;  %v1302_v60 = vmul.f32 %v1298_v3, %v2610_v15  ;;  %v1304_v23 = vmul.f32 %v1298_v3, %v2611_v41 }
 0x4b2   :  { %1306 = vst [vmem:[#allocation6 + $0x30] sm:$0xff] %v1299_v30  ;;  %1308 = vst [vmem:[#allocation6 + $0x40] sm:$0xff] %v1301_v34 }
 0x4b3   :  { %1310 = vst [vmem:[#allocation6 + $0x50] sm:$0xff] %v1303_v35  ;;  %1307 = vst [vmem:[#allocation6 + $0x38] sm:$0xff] %v1300_v10 }
 0x4b4   :  { %1309 = vst [vmem:[#allocation6 + $0x48] sm:$0xff] %v1302_v60  ;;  %1311 = vst [vmem:[#allocation6 + $0x58] sm:$0xff] %v1304_v23 }
 0x4b5   :  { %1480 = shalt.err (!%p1477_p12)
}
 0x4b6   :  { %s1481_s0 = scalar_lea.hbm %s2543_s8, 1536 }
 0x4b7   :  { %p1482_p13 = scmp.ne.s32.totalorder %s2543_s8, %s1481_s0  ;;  %p1485_p0 = scmp.lt.u32.totalorder %s1481_s0, %s2543_s8 }
 0x4b9   :  { %p1487_p1 = pnand %p1485_p0, %p1482_p13 }
 0x4bb   :  { %1490 = shalt.err (!%p1487_p1)
}
 0x4bc   :  { %1323 = dma.vmem_to_hbm [thread:$0]  %s1318_s13, 1536, %s2543_s8, [#allocation5], %s1496_s15, %s1496_s15, %s1497_s16  }
 0x4bd   :  { %1493 = dma.done.wait [#allocation5], 1536  }
 0x4be   :  { %1494 = vsyncadd [#allocation5], 4294965760 }
 0x4bf   :  { %1327 = vsyncpa [#allocation4], 1 }
 0x4c0   :  { %1328 = vsyncpa [#allocation5], 1 }

</bundles_post_ra>
